<compile_context>
chip_gen: v5e
topology: v5e:2x2
jax: 0.10.0
libtpu: 0.0.40
codegen_flags: <defaults>
</compile_context>

<pallas_src>
import functools

import jax
import jax.numpy as jnp
from jax.experimental import pallas as pl
from jax.experimental.pallas import tpu as pltpu


# ------------------------------ tiling helpers ------------------------------ #
TM_PREF = 256     # dispatcher row tile (batch rows)
TN_PREF = 1024    # dispatcher lane (output-column) tile
TK_PREF = 1024    # dispatcher contraction tile
TD_PREF = 2048    # fused MLP kernel lane tile over D_pad
VMEM_LIMIT = 32 * 1024 * 1024   # safe on v5e/v6e/v7x; actual usage ~7 MiB


def _round_up(x, m):
    return (x + m - 1) // m * m


def _pick_tile(dim, pref, align):
    """Largest tile <= pref that divides dim (dim is either <= pref or a multiple
    of align by construction, so the loop always terminates)."""
    if dim <= pref:
        return dim
    t = (pref // align) * align
    while dim % t:
        t -= align
    return t


# ----------------------- kernel 1: dispatcher matmul ------------------------ #
def _disp_kernel_acc(x_ref, w_ref, b_ref, o_ref, acc_ref, *, n_k):
    """o = relu(x @ w + b), accumulating over the K grid axis in f32 scratch."""
    @pl.when(pl.program_id(2) == 0)
    def _init():
        acc_ref[...] = jnp.zeros_like(acc_ref)

    acc_ref[...] += jnp.dot(x_ref[...], w_ref[...],
                            preferred_element_type=jnp.float32)

    @pl.when(pl.program_id(2) == n_k - 1)
    def _finalize():
        o_ref[...] = jnp.maximum(acc_ref[...] + b_ref[...], 0.0).astype(o_ref.dtype)


def _disp_kernel_single(x_ref, w_ref, b_ref, o_ref):
    """Fast path when the whole contraction fits one K tile (no scratch/epilogue)."""
    y = jnp.dot(x_ref[...], w_ref[...], preferred_element_type=jnp.float32)
    o_ref[...] = jnp.maximum(y + b_ref[...], 0.0).astype(o_ref.dtype)


def pallas_dispatcher(xb, w, b, out_dtype=jnp.bfloat16):
    """relu(xb @ w + b).  xb:(M,K) bf16, w:(K,N) bf16, b:(1,N) f32, all pre-padded."""
    M, K = xb.shape
    Kw, N = w.shape
    assert K == Kw and b.shape == (1, N)
    tm = _pick_tile(M, TM_PREF, 16)
    tk = _pick_tile(K, TK_PREF, 128)
    tn = _pick_tile(N, TN_PREF, 128)
    n_k = K // tk

    if n_k == 1:
        kernel = _disp_kernel_single
        scratch = []
    else:
        kernel = functools.partial(_disp_kernel_acc, n_k=n_k)
        scratch = [pltpu.VMEM((tm, tn), jnp.float32)]

    return pl.pallas_call(
        kernel,
        out_shape=jax.ShapeDtypeStruct((M, N), out_dtype),
        grid=(M // tm, N // tn, n_k),
        in_specs=[
            pl.BlockSpec((tm, tk), lambda i, j, k: (i, k)),
            pl.BlockSpec((tk, tn), lambda i, j, k: (k, j)),
            pl.BlockSpec((1, tn), lambda i, j, k: (0, j)),
        ],
        out_specs=pl.BlockSpec((tm, tn), lambda i, j, k: (i, j)),
        scratch_shapes=scratch,
        compiler_params=pltpu.CompilerParams(
            dimension_semantics=("parallel", "parallel", "arbitrary"),
            vmem_limit_bytes=VMEM_LIMIT),
    )(xb, w, b)


# ---------------- kernel 2: fused hidden MLP stack + output head ------------ #
def _mlp_head_kernel(h_ref, *rest, n_hidden, tb):
    """rest = (W1, b1, ..., Wn, bn, w_out, b_out(SMEM 1x1), o_ref).

    h_ref block: (tb, H0, td) bf16, channel-major slab per batch row.
    For each row b: a = h_ref[b] (H0, td); a = relu(W_i @ a + b_i); y = w_out @ a + b_out.
    Output block: (tb, td) f32 -> lane-dense stores.
    """
    o_ref = rest[-1]
    hid_w = [rest[2 * i][...] for i in range(n_hidden)]
    hid_b = [rest[2 * i + 1][...] for i in range(n_hidden)]
    w_out = rest[2 * n_hidden][...]
    b_out = rest[2 * n_hidden + 1][0, 0]

    for b in range(tb):
        a = h_ref[b]                                    # (H_in, td) bf16
        for i in range(n_hidden):
            a = jnp.maximum(
                jnp.dot(hid_w[i], a, preferred_element_type=jnp.float32)
                + hid_b[i], 0.0).astype(jnp.bfloat16)
        y = jnp.dot(w_out, a, preferred_element_type=jnp.float32) + b_out  # (1, td)
        o_ref[b:b + 1, :] = y.astype(o_ref.dtype)


def pallas_mlp_head(h3, hidden, out_w, out_b, out_dtype=jnp.float32):
    """h3: (B_pad, H0, D_pad) bf16; hidden: [(W(H_out,H_in) bf16, b(H_out,1) f32)];
    out_w: (1, H_last) bf16; out_b: (1,1) f32.  Returns x_m_pad (B_pad, D_pad)."""
    B_pad, H0, D_pad = h3.shape
    tb = 8 if B_pad % 8 == 0 else B_pad
    td = _pick_tile(D_pad, TD_PREF, 128)
    n_hidden = len(hidden)

    in_specs = [pl.BlockSpec((tb, H0, td), lambda i, j: (i, 0, j))]
    args = [h3]
    for w, bias in hidden:                       # small weights stay VMEM-resident
        in_specs.append(pl.BlockSpec(w.shape, lambda i, j: (0, 0)))
        in_specs.append(pl.BlockSpec(bias.shape, lambda i, j: (0, 0)))
        args += [w, bias]
    in_specs.append(pl.BlockSpec(out_w.shape, lambda i, j: (0, 0)))
    in_specs.append(pl.BlockSpec(memory_space=pltpu.MemorySpace.SMEM))
    args += [out_w, out_b]

    return pl.pallas_call(
        functools.partial(_mlp_head_kernel, n_hidden=n_hidden, tb=tb),
        out_shape=jax.ShapeDtypeStruct((B_pad, D_pad), out_dtype),
        grid=(B_pad // tb, D_pad // td),
        in_specs=in_specs,
        out_specs=pl.BlockSpec((tb, td), lambda i, j: (i, j)),
        compiler_params=pltpu.CompilerParams(
            dimension_semantics=("parallel", "parallel"),
            vmem_limit_bytes=VMEM_LIMIT),
    )(*args)


# --------------------------- parameters & forward --------------------------- #
def init_params(key, in_dim, hidden_dims, adjacency_p=2.0):
    """Deterministic synthetic init matching the module's parameter shapes."""
    ks = iter(jax.random.split(key, 4 + 2 * len(hidden_dims)))
    h0 = hidden_dims[0]
    params = {}
    b0 = 1.0 / in_dim / (h0 ** (1.0 / adjacency_p))
    params["disp_weight"] = jax.random.uniform(next(ks), (in_dim, in_dim, h0),
                                               jnp.float32, -b0, b0)
    params["disp_bias"] = jax.random.uniform(next(ks), (in_dim, h0),
                                             jnp.float32, -b0, b0)
    params["disp_mask"] = jnp.ones((in_dim, in_dim), jnp.float32)
    hidden = []
    for i in range(len(hidden_dims) - 1):
        bound = 1.0 / (hidden_dims[i] ** 0.5)
        W = jax.random.uniform(next(ks), (hidden_dims[i + 1], hidden_dims[i]),
                               jnp.float32, -bound, bound)
        b = jax.random.uniform(next(ks), (hidden_dims[i + 1],),
                               jnp.float32, -bound, bound)
        hidden.append((W, b))
    params["hidden"] = hidden
    bound = 1.0 / (hidden_dims[-1] ** 0.5)
    params["out_W"] = jax.random.uniform(next(ks), (1, hidden_dims[-1]),
                                         jnp.float32, -bound, bound)
    params["out_b"] = jax.random.uniform(next(ks), (1,), jnp.float32, -bound, bound)
    return params


def prepare_params(raw, compute_dtype=jnp.bfloat16):
    """One-time host-side preprocessing (hoisted out of the forward pass):
    fold the dispatcher mask only if it isn't all-ones, flatten the dispatcher
    weight channel-major to a (K_pad, H0*D_pad) bf16 matmul operand (zero-padded),
    keep hidden weights in (H_out, H_in) bf16 form with (H_out, 1) f32 biases."""
    D_in, D_out, H0 = raw["disp_weight"].shape
    w = raw["disp_weight"]
    mask = raw.get("disp_mask")
    if mask is not None and not bool(jnp.all(mask == 1.0)):
        w = w * mask[:, :, None]

    K_pad = _round_up(D_in, 128)
    D_pad = _round_up(D_out, 128)
    # channel-major columns: col (h*D_pad + d) = W[i, d, h]
    w_t = jnp.transpose(w, (0, 2, 1))                                   # (D_in, H0, D_out)
    w_t = jnp.pad(w_t, ((0, K_pad - D_in), (0, 0), (0, D_pad - D_out)))
    disp_w = w_t.reshape(K_pad, H0 * D_pad).astype(compute_dtype)
    b_t = jnp.pad(raw["disp_bias"].T, ((0, 0), (0, D_pad - D_out)))     # (H0, D_pad)
    disp_b = b_t.reshape(1, H0 * D_pad).astype(jnp.float32)

    hidden = [(jnp.asarray(W).astype(compute_dtype),
               jnp.asarray(b).reshape(-1, 1).astype(jnp.float32))
              for W, b in raw["hidden"]]
    out_w = jnp.asarray(raw["out_W"]).astype(compute_dtype)             # (1, H_last)
    out_b = jnp.asarray(raw["out_b"]).reshape(1, 1).astype(jnp.float32)

    return {"D_in": D_in, "D_out": D_out, "H0": H0,
            "K_pad": K_pad, "D_pad": D_pad,
            "disp_w": disp_w, "disp_b": disp_b,
            "hidden": hidden, "out_w": out_w, "out_b": out_b,
            "compute_dtype": compute_dtype}


def autoencoder_forward(prepared, x):
    """x: (B, in_dim) f32 -> (x_m, x_v), each (B, in_dim) f32."""
    B, D = x.shape
    assert D == prepared["D_in"]
    K_pad, D_pad, H0 = prepared["K_pad"], prepared["D_pad"], prepared["H0"]
    B_pad = _round_up(max(B, 1), 16)                    # 16-row align for bf16 packing

    xb = x.astype(prepared["compute_dtype"])
    if (B_pad, K_pad) != (B, D):
        xb = jnp.pad(xb, ((0, B_pad - B), (0, K_pad - D)))

    # Dispatcher: einsum('ni,ioh->noh') == x @ W_flat (channel-major), bias+ReLU fused.
    h = pallas_dispatcher(xb, prepared["disp_w"], prepared["disp_b"])    # (B_pad, H0*D_pad) bf16
    h3 = h.reshape(B_pad, H0, D_pad)                    # layout-preserving view, no copy

    # Shared hidden layers + Linear(H_last, 1) head, fused; lane-dense x_m output.
    xm_pad = pallas_mlp_head(h3, prepared["hidden"], prepared["out_w"],
                             prepared["out_b"], jnp.float32)             # (B_pad, D_pad)
    x_m = xm_pad[:B, :D]                                # strip only output-sized padding
    x_v = jnp.ones_like(x_m)                            # 'unit' variance flavor
    return x_m, x_v


def reference_forward(raw, x):
    """Pure-JAX f32 reference mirroring the PyTorch forward (uses the raw params)."""
    w0 = raw["disp_weight"] * raw["disp_mask"][:, :, None]
    h = jax.nn.relu(jnp.einsum("ni,ioh->noh", x, w0) + raw["disp_bias"])
    for W, b in raw["hidden"]:
        h = jax.nn.relu(jnp.einsum("ndh,oh->ndo", h, W) + b)
    x_m = (jnp.einsum("ndh,oh->ndo", h, raw["out_W"]) + raw["out_b"])[..., 0]
    return x_m, jnp.ones_like(x_m)


# TODO(synk): loss()/dag_reg paths (SCCPowerIteration uses scipy.sparse.csgraph on the
# host), the Gumbel-adjacency branch and the 'nn'/'parameter' variance flavors are not
# part of the default forward() and are not implemented here.

if __name__ == "__main__":
    B, IN_DIM = 6, 16                 # B=6 exercises batch padding (-> 16 rows)
    HIDDEN_DIMS = (32, 32)

    key = jax.random.PRNGKey(0)
    k_params, k_x = jax.random.split(key)
    raw_params = init_params(k_params, IN_DIM, HIDDEN_DIMS)
    prepared = prepare_params(raw_params)
    x = jax.random.normal(k_x, (B, IN_DIM), jnp.float32)

    fwd = jax.jit(lambda xx: autoencoder_forward(prepared, xx))
    x_m, x_v = jax.block_until_ready(fwd(x))
    ref_m, ref_v = reference_forward(raw_params, x)

    assert x_m.shape == (B, IN_DIM) and x_v.shape == (B, IN_DIM)
    max_err = float(jnp.max(jnp.abs(x_m - ref_m)))
    # bf16 weight/activation streaming with f32 accumulation -> loose tolerance.
    assert jnp.allclose(x_m, ref_m, atol=3e-2, rtol=3e-2), f"mean mismatch {max_err}"
    assert jnp.allclose(x_v, ref_v), "variance mismatch"
    print("KERNEL_OK")
</pallas_src>

<mosaic_0001>
module attributes {stable_mosaic.version = 11 : i64} {
  func.func @_disp_kernel_single(%arg0: i32, %arg1: i32, %arg2: i32, %arg3: memref<16x128xbf16, #tpu.memory_space<vmem>>, %arg4: memref<128x1024xbf16, #tpu.memory_space<vmem>>, %arg5: memref<1x1024xf32, #tpu.memory_space<vmem>>, %arg6: memref<16x1024xbf16, #tpu.memory_space<vmem>>) attributes {dimension_semantics = [#tpu.dimension_semantics<parallel>, #tpu.dimension_semantics<parallel>, #tpu.dimension_semantics<arbitrary>], iteration_bounds = array<i64: 1, 4, 1>, scalar_prefetch = 0 : i64, scratch_operands = 0 : i64, tpu.core_type = #tpu.core_type<tc>, window_params = [{transform_indices = @transform_0, window_bounds = array<i64: 16, 128>}, {transform_indices = @transform_1, window_bounds = array<i64: 128, 1024>}, {transform_indices = @transform_2, window_bounds = array<i64: 1, 1024>}, {transform_indices = @transform_3, window_bounds = array<i64: 16, 1024>}]} {
    %c0 = arith.constant 0 : index
    %c0_0 = arith.constant 0 : index
    %0 = vector.load %arg3[%c0, %c0_0] : memref<16x128xbf16, #tpu.memory_space<vmem>>, vector<16x128xbf16>
    %c0_1 = arith.constant 0 : index
    %c0_2 = arith.constant 0 : index
    %1 = vector.load %arg4[%c0_1, %c0_2] : memref<128x1024xbf16, #tpu.memory_space<vmem>>, vector<128x1024xbf16>
    %cst = arith.constant dense<0.000000e+00> : vector<16x1024xf32>
    %2 = tpu.matmul %0, %1, %cst {dimension_numbers = #tpu.dot_dimension_numbers<[1], [0], [0], [1], [0, 0, 1, 1], [], []>} : vector<16x128xbf16>, vector<128x1024xbf16>, vector<16x1024xf32> -> vector<16x1024xf32>
    %c0_3 = arith.constant 0 : index
    %c0_4 = arith.constant 0 : index
    %3 = vector.load %arg5[%c0_3, %c0_4] : memref<1x1024xf32, #tpu.memory_space<vmem>>, vector<1x1024xf32>
    %4 = vector.broadcast %3 : vector<1x1024xf32> to vector<16x1024xf32>
    %5 = arith.addf %2, %4 : vector<16x1024xf32>
    %cst_5 = arith.constant 0.000000e+00 : f32
    %6 = vector.broadcast %cst_5 : f32 to vector<16x1024xf32>
    %7 = arith.maximumf %5, %6 : vector<16x1024xf32>
    %8 = arith.truncf %7 : vector<16x1024xf32> to vector<16x1024xbf16>
    %c0_6 = arith.constant 0 : index
    %c0_7 = arith.constant 0 : index
    %9 = vector.load %arg6[%c0_6, %c0_7] : memref<16x1024xbf16, #tpu.memory_space<vmem>>, vector<16x1024xbf16>
    tpu.vector_store %arg6[%c0_6, %c0_7], %8 {strides = array<i32>} : memref<16x1024xbf16, #tpu.memory_space<vmem>>, vector<16x1024xbf16>,
    return
  }
  func.func @transform_0(%arg0: i32, %arg1: i32, %arg2: i32) -> (i32, i32) {
    %c0_i32 = arith.constant 0 : i32
    return %arg0, %arg2 : i32, i32
  }
  func.func @transform_1(%arg0: i32, %arg1: i32, %arg2: i32) -> (i32, i32) {
    %c0_i32 = arith.constant 0 : i32
    return %arg2, %arg1 : i32, i32
  }
  func.func @transform_2(%arg0: i32, %arg1: i32, %arg2: i32) -> (i32, i32) {
    %c0_i32 = arith.constant 0 : i32
    %c0_i32_0 = arith.constant 0 : i32
    return %c0_i32, %arg1 : i32, i32
  }
  func.func @transform_3(%arg0: i32, %arg1: i32, %arg2: i32) -> (i32, i32) {
    %c0_i32 = arith.constant 0 : i32
    return %arg0, %arg1 : i32, i32
  }
}

module attributes {stable_mosaic.version = 11 : i64} {
  func.func @_mlp_head_kernel(%arg0: i32, %arg1: i32, %arg2: memref<8x32x128xbf16, #tpu.memory_space<vmem>>, %arg3: memref<32x32xbf16, #tpu.memory_space<vmem>>, %arg4: memref<32x1xf32, #tpu.memory_space<vmem>>, %arg5: memref<1x32xbf16, #tpu.memory_space<vmem>>, %arg6: memref<1x1xf32, #tpu.memory_space<smem>>, %arg7: memref<8x128xf32, #tpu.memory_space<vmem>>) attributes {dimension_semantics = [#tpu.dimension_semantics<parallel>, #tpu.dimension_semantics<parallel>], iteration_bounds = array<i64: 2, 1>, scalar_prefetch = 0 : i64, scratch_operands = 0 : i64, tpu.core_type = #tpu.core_type<tc>, window_params = [{transform_indices = @transform_0, window_bounds = array<i64: 8, 32, 128>}, {pipeline_mode = #tpu.pipeline_mode<synchronous>, transform_indices = @transform_1, window_bounds = array<i64: 32, 32>}, {pipeline_mode = #tpu.pipeline_mode<synchronous>, transform_indices = @transform_2, window_bounds = array<i64: 32, 1>}, {pipeline_mode = #tpu.pipeline_mode<synchronous>, transform_indices = @transform_3, window_bounds = array<i64: 1, 32>}, {transform_indices = @transform_4, window_bounds = array<i64: 1, 1>}, {transform_indices = @transform_5, window_bounds = array<i64: 8, 128>}]} {
    %c0 = arith.constant 0 : index
    %c0_0 = arith.constant 0 : index
    %0 = vector.load %arg3[%c0, %c0_0] : memref<32x32xbf16, #tpu.memory_space<vmem>>, vector<32x32xbf16>
    %c0_1 = arith.constant 0 : index
    %c0_2 = arith.constant 0 : index
    %1 = vector.load %arg4[%c0_1, %c0_2] : memref<32x1xf32, #tpu.memory_space<vmem>>, vector<32x1xf32>
    %c0_3 = arith.constant 0 : index
    %c0_4 = arith.constant 0 : index
    %2 = vector.load %arg5[%c0_3, %c0_4] : memref<1x32xbf16, #tpu.memory_space<vmem>>, vector<1x32xbf16>
    %c0_5 = arith.constant 0 : index
    %c0_6 = arith.constant 0 : index
    %3 = memref.load %arg6[%c0_5, %c0_6] : memref<1x1xf32, #tpu.memory_space<smem>>
    %c0_7 = arith.constant 0 : index
    %c0_8 = arith.constant 0 : index
    %c0_9 = arith.constant 0 : index
    %4 = vector.load %arg2[%c0_7, %c0_8, %c0_9] : memref<8x32x128xbf16, #tpu.memory_space<vmem>>, vector<1x32x128xbf16>
    %5 = vector.shape_cast %4 : vector<1x32x128xbf16> to vector<32x128xbf16>
    %cst = arith.constant dense<0.000000e+00> : vector<32x128xf32>
    %6 = tpu.matmul %0, %5, %cst {dimension_numbers = #tpu.dot_dimension_numbers<[1], [0], [0], [1], [0, 0, 1, 1], [], []>} : vector<32x32xbf16>, vector<32x128xbf16>, vector<32x128xf32> -> vector<32x128xf32>
    %7 = vector.broadcast %1 : vector<32x1xf32> to vector<32x128xf32>
    %8 = arith.addf %6, %7 : vector<32x128xf32>
    %cst_10 = arith.constant 0.000000e+00 : f32
    %9 = vector.broadcast %cst_10 : f32 to vector<32x128xf32>
    %10 = arith.maximumf %8, %9 : vector<32x128xf32>
    %11 = arith.truncf %10 : vector<32x128xf32> to vector<32x128xbf16>
    %cst_11 = arith.constant dense<0.000000e+00> : vector<1x128xf32>
    %12 = tpu.matmul %2, %11, %cst_11 {dimension_numbers = #tpu.dot_dimension_numbers<[1], [0], [0], [1], [0, 0, 1, 1], [], []>} : vector<1x32xbf16>, vector<32x128xbf16>, vector<1x128xf32> -> vector<1x128xf32>
    %13 = vector.broadcast %3 : f32 to vector<1x128xf32>
    %14 = arith.addf %12, %13 : vector<1x128xf32>
    %c0_12 = arith.constant 0 : index
    %c0_13 = arith.constant 0 : index
    %15 = vector.load %arg7[%c0_12, %c0_13] : memref<8x128xf32, #tpu.memory_space<vmem>>, vector<1x128xf32>
    tpu.vector_store %arg7[%c0_12, %c0_13], %14 {strides = array<i32>} : memref<8x128xf32, #tpu.memory_space<vmem>>, vector<1x128xf32>,
    %c1 = arith.constant 1 : index
    %c0_14 = arith.constant 0 : index
    %c0_15 = arith.constant 0 : index
    %16 = vector.load %arg2[%c1, %c0_14, %c0_15] : memref<8x32x128xbf16, #tpu.memory_space<vmem>>, vector<1x32x128xbf16>
    %17 = vector.shape_cast %16 : vector<1x32x128xbf16> to vector<32x128xbf16>
    %cst_16 = arith.constant dense<0.000000e+00> : vector<32x128xf32>
    %18 = tpu.matmul %0, %17, %cst_16 {dimension_numbers = #tpu.dot_dimension_numbers<[1], [0], [0], [1], [0, 0, 1, 1], [], []>} : vector<32x32xbf16>, vector<32x128xbf16>, vector<32x128xf32> -> vector<32x128xf32>
    %19 = vector.broadcast %1 : vector<32x1xf32> to vector<32x128xf32>
    %20 = arith.addf %18, %19 : vector<32x128xf32>
    %cst_17 = arith.constant 0.000000e+00 : f32
    %21 = vector.broadcast %cst_17 : f32 to vector<32x128xf32>
    %22 = arith.maximumf %20, %21 : vector<32x128xf32>
    %23 = arith.truncf %22 : vector<32x128xf32> to vector<32x128xbf16>
    %cst_18 = arith.constant dense<0.000000e+00> : vector<1x128xf32>
    %24 = tpu.matmul %2, %23, %cst_18 {dimension_numbers = #tpu.dot_dimension_numbers<[1], [0], [0], [1], [0, 0, 1, 1], [], []>} : vector<1x32xbf16>, vector<32x128xbf16>, vector<1x128xf32> -> vector<1x128xf32>
    %25 = vector.broadcast %3 : f32 to vector<1x128xf32>
    %26 = arith.addf %24, %25 : vector<1x128xf32>
    %c1_19 = arith.constant 1 : index
    %c0_20 = arith.constant 0 : index
    %27 = vector.load %arg7[%c1_19, %c0_20] : memref<8x128xf32, #tpu.memory_space<vmem>>, vector<1x128xf32>
    tpu.vector_store %arg7[%c1_19, %c0_20], %26 {strides = array<i32>} : memref<8x128xf32, #tpu.memory_space<vmem>>, vector<1x128xf32>,
    %c2 = arith.constant 2 : index
    %c0_21 = arith.constant 0 : index
    %c0_22 = arith.constant 0 : index
    %28 = vector.load %arg2[%c2, %c0_21, %c0_22] : memref<8x32x128xbf16, #tpu.memory_space<vmem>>, vector<1x32x128xbf16>
    %29 = vector.shape_cast %28 : vector<1x32x128xbf16> to vector<32x128xbf16>
    %cst_23 = arith.constant dense<0.000000e+00> : vector<32x128xf32>
    %30 = tpu.matmul %0, %29, %cst_23 {dimension_numbers = #tpu.dot_dimension_numbers<[1], [0], [0], [1], [0, 0, 1, 1], [], []>} : vector<32x32xbf16>, vector<32x128xbf16>, vector<32x128xf32> -> vector<32x128xf32>
    %31 = vector.broadcast %1 : vector<32x1xf32> to vector<32x128xf32>
    %32 = arith.addf %30, %31 : vector<32x128xf32>
    %cst_24 = arith.constant 0.000000e+00 : f32
    %33 = vector.broadcast %cst_24 : f32 to vector<32x128xf32>
    %34 = arith.maximumf %32, %33 : vector<32x128xf32>
    %35 = arith.truncf %34 : vector<32x128xf32> to vector<32x128xbf16>
    %cst_25 = arith.constant dense<0.000000e+00> : vector<1x128xf32>
    %36 = tpu.matmul %2, %35, %cst_25 {dimension_numbers = #tpu.dot_dimension_numbers<[1], [0], [0], [1], [0, 0, 1, 1], [], []>} : vector<1x32xbf16>, vector<32x128xbf16>, vector<1x128xf32> -> vector<1x128xf32>
    %37 = vector.broadcast %3 : f32 to vector<1x128xf32>
    %38 = arith.addf %36, %37 : vector<1x128xf32>
    %c2_26 = arith.constant 2 : index
    %c0_27 = arith.constant 0 : index
    %39 = vector.load %arg7[%c2_26, %c0_27] : memref<8x128xf32, #tpu.memory_space<vmem>>, vector<1x128xf32>
    tpu.vector_store %arg7[%c2_26, %c0_27], %38 {strides = array<i32>} : memref<8x128xf32, #tpu.memory_space<vmem>>, vector<1x128xf32>,
    %c3 = arith.constant 3 : index
    %c0_28 = arith.constant 0 : index
    %c0_29 = arith.constant 0 : index
    %40 = vector.load %arg2[%c3, %c0_28, %c0_29] : memref<8x32x128xbf16, #tpu.memory_space<vmem>>, vector<1x32x128xbf16>
    %41 = vector.shape_cast %40 : vector<1x32x128xbf16> to vector<32x128xbf16>
    %cst_30 = arith.constant dense<0.000000e+00> : vector<32x128xf32>
    %42 = tpu.matmul %0, %41, %cst_30 {dimension_numbers = #tpu.dot_dimension_numbers<[1], [0], [0], [1], [0, 0, 1, 1], [], []>} : vector<32x32xbf16>, vector<32x128xbf16>, vector<32x128xf32> -> vector<32x128xf32>
    %43 = vector.broadcast %1 : vector<32x1xf32> to vector<32x128xf32>
    %44 = arith.addf %42, %43 : vector<32x128xf32>
    %cst_31 = arith.constant 0.000000e+00 : f32
    %45 = vector.broadcast %cst_31 : f32 to vector<32x128xf32>
    %46 = arith.maximumf %44, %45 : vector<32x128xf32>
    %47 = arith.truncf %46 : vector<32x128xf32> to vector<32x128xbf16>
    %cst_32 = arith.constant dense<0.000000e+00> : vector<1x128xf32>
    %48 = tpu.matmul %2, %47, %cst_32 {dimension_numbers = #tpu.dot_dimension_numbers<[1], [0], [0], [1], [0, 0, 1, 1], [], []>} : vector<1x32xbf16>, vector<32x128xbf16>, vector<1x128xf32> -> vector<1x128xf32>
    %49 = vector.broadcast %3 : f32 to vector<1x128xf32>
    %50 = arith.addf %48, %49 : vector<1x128xf32>
    %c3_33 = arith.constant 3 : index
    %c0_34 = arith.constant 0 : index
    %51 = vector.load %arg7[%c3_33, %c0_34] : memref<8x128xf32, #tpu.memory_space<vmem>>, vector<1x128xf32>
    tpu.vector_store %arg7[%c3_33, %c0_34], %50 {strides = array<i32>} : memref<8x128xf32, #tpu.memory_space<vmem>>, vector<1x128xf32>,
    %c4 = arith.constant 4 : index
    %c0_35 = arith.constant 0 : index
    %c0_36 = arith.constant 0 : index
    %52 = vector.load %arg2[%c4, %c0_35, %c0_36] : memref<8x32x128xbf16, #tpu.memory_space<vmem>>, vector<1x32x128xbf16>
    %53 = vector.shape_cast %52 : vector<1x32x128xbf16> to vector<32x128xbf16>
    %cst_37 = arith.constant dense<0.000000e+00> : vector<32x128xf32>
    %54 = tpu.matmul %0, %53, %cst_37 {dimension_numbers = #tpu.dot_dimension_numbers<[1], [0], [0], [1], [0, 0, 1, 1], [], []>} : vector<32x32xbf16>, vector<32x128xbf16>, vector<32x128xf32> -> vector<32x128xf32>
    %55 = vector.broadcast %1 : vector<32x1xf32> to vector<32x128xf32>
    %56 = arith.addf %54, %55 : vector<32x128xf32>
    %cst_38 = arith.constant 0.000000e+00 : f32
    %57 = vector.broadcast %cst_38 : f32 to vector<32x128xf32>
    %58 = arith.maximumf %56, %57 : vector<32x128xf32>
    %59 = arith.truncf %58 : vector<32x128xf32> to vector<32x128xbf16>
    %cst_39 = arith.constant dense<0.000000e+00> : vector<1x128xf32>
    %60 = tpu.matmul %2, %59, %cst_39 {dimension_numbers = #tpu.dot_dimension_numbers<[1], [0], [0], [1], [0, 0, 1, 1], [], []>} : vector<1x32xbf16>, vector<32x128xbf16>, vector<1x128xf32> -> vector<1x128xf32>
    %61 = vector.broadcast %3 : f32 to vector<1x128xf32>
    %62 = arith.addf %60, %61 : vector<1x128xf32>
    %c4_40 = arith.constant 4 : index
    %c0_41 = arith.constant 0 : index
    %63 = vector.load %arg7[%c4_40, %c0_41] : memref<8x128xf32, #tpu.memory_space<vmem>>, vector<1x128xf32>
    tpu.vector_store %arg7[%c4_40, %c0_41], %62 {strides = array<i32>} : memref<8x128xf32, #tpu.memory_space<vmem>>, vector<1x128xf32>,
    %c5 = arith.constant 5 : index
    %c0_42 = arith.constant 0 : index
    %c0_43 = arith.constant 0 : index
    %64 = vector.load %arg2[%c5, %c0_42, %c0_43] : memref<8x32x128xbf16, #tpu.memory_space<vmem>>, vector<1x32x128xbf16>
    %65 = vector.shape_cast %64 : vector<1x32x128xbf16> to vector<32x128xbf16>
    %cst_44 = arith.constant dense<0.000000e+00> : vector<32x128xf32>
    %66 = tpu.matmul %0, %65, %cst_44 {dimension_numbers = #tpu.dot_dimension_numbers<[1], [0], [0], [1], [0, 0, 1, 1], [], []>} : vector<32x32xbf16>, vector<32x128xbf16>, vector<32x128xf32> -> vector<32x128xf32>
    %67 = vector.broadcast %1 : vector<32x1xf32> to vector<32x128xf32>
    %68 = arith.addf %66, %67 : vector<32x128xf32>
    %cst_45 = arith.constant 0.000000e+00 : f32
    %69 = vector.broadcast %cst_45 : f32 to vector<32x128xf32>
    %70 = arith.maximumf %68, %69 : vector<32x128xf32>
    %71 = arith.truncf %70 : vector<32x128xf32> to vector<32x128xbf16>
    %cst_46 = arith.constant dense<0.000000e+00> : vector<1x128xf32>
    %72 = tpu.matmul %2, %71, %cst_46 {dimension_numbers = #tpu.dot_dimension_numbers<[1], [0], [0], [1], [0, 0, 1, 1], [], []>} : vector<1x32xbf16>, vector<32x128xbf16>, vector<1x128xf32> -> vector<1x128xf32>
    %73 = vector.broadcast %3 : f32 to vector<1x128xf32>
    %74 = arith.addf %72, %73 : vector<1x128xf32>
    %c5_47 = arith.constant 5 : index
    %c0_48 = arith.constant 0 : index
    %75 = vector.load %arg7[%c5_47, %c0_48] : memref<8x128xf32, #tpu.memory_space<vmem>>, vector<1x128xf32>
    tpu.vector_store %arg7[%c5_47, %c0_48], %74 {strides = array<i32>} : memref<8x128xf32, #tpu.memory_space<vmem>>, vector<1x128xf32>,
    %c6 = arith.constant 6 : index
    %c0_49 = arith.constant 0 : index
    %c0_50 = arith.constant 0 : index
    %76 = vector.load %arg2[%c6, %c0_49, %c0_50] : memref<8x32x128xbf16, #tpu.memory_space<vmem>>, vector<1x32x128xbf16>
    %77 = vector.shape_cast %76 : vector<1x32x128xbf16> to vector<32x128xbf16>
    %cst_51 = arith.constant dense<0.000000e+00> : vector<32x128xf32>
    %78 = tpu.matmul %0, %77, %cst_51 {dimension_numbers = #tpu.dot_dimension_numbers<[1], [0], [0], [1], [0, 0, 1, 1], [], []>} : vector<32x32xbf16>, vector<32x128xbf16>, vector<32x128xf32> -> vector<32x128xf32>
    %79 = vector.broadcast %1 : vector<32x1xf32> to vector<32x128xf32>
    %80 = arith.addf %78, %79 : vector<32x128xf32>
    %cst_52 = arith.constant 0.000000e+00 : f32
    %81 = vector.broadcast %cst_52 : f32 to vector<32x128xf32>
    %82 = arith.maximumf %80, %81 : vector<32x128xf32>
    %83 = arith.truncf %82 : vector<32x128xf32> to vector<32x128xbf16>
    %cst_53 = arith.constant dense<0.000000e+00> : vector<1x128xf32>
    %84 = tpu.matmul %2, %83, %cst_53 {dimension_numbers = #tpu.dot_dimension_numbers<[1], [0], [0], [1], [0, 0, 1, 1], [], []>} : vector<1x32xbf16>, vector<32x128xbf16>, vector<1x128xf32> -> vector<1x128xf32>
    %85 = vector.broadcast %3 : f32 to vector<1x128xf32>
    %86 = arith.addf %84, %85 : vector<1x128xf32>
    %c6_54 = arith.constant 6 : index
    %c0_55 = arith.constant 0 : index
    %87 = vector.load %arg7[%c6_54, %c0_55] : memref<8x128xf32, #tpu.memory_space<vmem>>, vector<1x128xf32>
    tpu.vector_store %arg7[%c6_54, %c0_55], %86 {strides = array<i32>} : memref<8x128xf32, #tpu.memory_space<vmem>>, vector<1x128xf32>,
    %c7 = arith.constant 7 : index
    %c0_56 = arith.constant 0 : index
    %c0_57 = arith.constant 0 : index
    %88 = vector.load %arg2[%c7, %c0_56, %c0_57] : memref<8x32x128xbf16, #tpu.memory_space<vmem>>, vector<1x32x128xbf16>
    %89 = vector.shape_cast %88 : vector<1x32x128xbf16> to vector<32x128xbf16>
    %cst_58 = arith.constant dense<0.000000e+00> : vector<32x128xf32>
    %90 = tpu.matmul %0, %89, %cst_58 {dimension_numbers = #tpu.dot_dimension_numbers<[1], [0], [0], [1], [0, 0, 1, 1], [], []>} : vector<32x32xbf16>, vector<32x128xbf16>, vector<32x128xf32> -> vector<32x128xf32>
    %91 = vector.broadcast %1 : vector<32x1xf32> to vector<32x128xf32>
    %92 = arith.addf %90, %91 : vector<32x128xf32>
    %cst_59 = arith.constant 0.000000e+00 : f32
    %93 = vector.broadcast %cst_59 : f32 to vector<32x128xf32>
    %94 = arith.maximumf %92, %93 : vector<32x128xf32>
    %95 = arith.truncf %94 : vector<32x128xf32> to vector<32x128xbf16>
    %cst_60 = arith.constant dense<0.000000e+00> : vector<1x128xf32>
    %96 = tpu.matmul %2, %95, %cst_60 {dimension_numbers = #tpu.dot_dimension_numbers<[1], [0], [0], [1], [0, 0, 1, 1], [], []>} : vector<1x32xbf16>, vector<32x128xbf16>, vector<1x128xf32> -> vector<1x128xf32>
    %97 = vector.broadcast %3 : f32 to vector<1x128xf32>
    %98 = arith.addf %96, %97 : vector<1x128xf32>
    %c7_61 = arith.constant 7 : index
    %c0_62 = arith.constant 0 : index
    %99 = vector.load %arg7[%c7_61, %c0_62] : memref<8x128xf32, #tpu.memory_space<vmem>>, vector<1x128xf32>
    tpu.vector_store %arg7[%c7_61, %c0_62], %98 {strides = array<i32>} : memref<8x128xf32, #tpu.memory_space<vmem>>, vector<1x128xf32>,
    return
  }
  func.func @transform_0(%arg0: i32, %arg1: i32) -> (i32, i32, i32) {
    %c0_i32 = arith.constant 0 : i32
    %c0_i32_0 = arith.constant 0 : i32
    return %arg0, %c0_i32, %arg1 : i32, i32, i32
  }
  func.func @transform_1(%arg0: i32, %arg1: i32) -> (i32, i32) {
    %c0_i32 = arith.constant 0 : i32
    %c0_i32_0 = arith.constant 0 : i32
    %c0_i32_1 = arith.constant 0 : i32
    return %c0_i32, %c0_i32_0 : i32, i32
  }
  func.func @transform_2(%arg0: i32, %arg1: i32) -> (i32, i32) {
    %c0_i32 = arith.constant 0 : i32
    %c0_i32_0 = arith.constant 0 : i32
    %c0_i32_1 = arith.constant 0 : i32
    return %c0_i32, %c0_i32_0 : i32, i32
  }
  func.func @transform_3(%arg0: i32, %arg1: i32) -> (i32, i32) {
    %c0_i32 = arith.constant 0 : i32
    %c0_i32_0 = arith.constant 0 : i32
    %c0_i32_1 = arith.constant 0 : i32
    return %c0_i32, %c0_i32_0 : i32, i32
  }
  func.func @transform_4(%arg0: i32, %arg1: i32) -> (i32, i32) {
    %c0_i32 = arith.constant 0 : i32
    %c0_i32_0 = arith.constant 0 : i32
    %c0_i32_1 = arith.constant 0 : i32
    return %c0_i32, %c0_i32_0 : i32, i32
  }
  func.func @transform_5(%arg0: i32, %arg1: i32) -> (i32, i32) {
    %c0_i32 = arith.constant 0 : i32
    return %arg0, %arg1 : i32, i32
  }
}

</mosaic_0001>

<bundles_post_ra>
// kernel: _lambda_.3
= control target key start
LH: loop header
LB: loop body
LE: loop exit
PB: predicated region body
PF: predicated region fallthrough
CT: control target
= control target key end

     0   :  { %s1077_s20 = smov 0   ;;  %s1079_s21 = smov 0   ;;  %s1268_s0 = inlined_call_operand.vmem [shape: bf16[16,32,128], index: 0, kind: input, shape index: {}]   ;;  %s1269_s1 = inlined_call_operand.vmem [shape: bf16[32,32], index: 1, kind: input, shape index: {}]   ;;  %s1270_s2 = inlined_call_operand.vmem [shape: f32[32,1], index: 2, kind: input, shape index: {}]   ;;  %s1271_s3 = inlined_call_operand.vmem [shape: bf16[1,32], index: 3, kind: input, shape index: {}]   ;;  %s1272_s4 = inlined_call_operand.<no memory space> [shape: f32[1,1], index: 4, kind: input, shape index: {}]   ;;  %s1273_s5 = inlined_call_operand.vmem [shape: f32[16,128], index: 5, kind: output, shape index: {}]  }
   0x1   :  { %10 = sst [smem:[#allocation2]] %s1272_s4  ;;  %s1081_s22 = smov 0  }
   0x2 LB: > { %s28_s4 = sadd.s32 1, %s1037_s21  ;;  %p840_p0 = scmp.ge.s32.totalorder %s1041_s22, 1  ;;  %s1041_s22 = sphi %s1081_s22, %s16_s22   ;;  %s1037_s21 = sphi %s1079_s21, %s1275_s21   ;;  %s1033_s20 = sphi %s1077_s20, %s1274_s20  }
   0x3   : > { %p30_p1 = scmp.ge.s32.totalorder %s28_s4, 2  ;;  %p209_p2 = scmp.lt.s32.totalorder %s1041_s22, 3 }
   0x5   : > { %s1277_s4 = smov (%p30_p1, %s28_s4), 0  ;;  %p210_p3 = pnand %p840_p0, %p209_p2 }
   0x6   : > { %s841_s23 = sshll.u32 (!%p210_p3), %s1033_s20, 3  ;;  %p253_p5 = scmp.lt.s32.totalorder (!%p210_p3), %s1033_s20, 1 }
   0x7   : > { %213 = sbr.rel (%p210_p3) target bundleno = 859 (0x35b), region = 40  ;;  %p244_p4 = scmp.lt.s32.totalorder (!%p210_p3), %s841_s23, 15 }
   0x8   : > { %s270_s17 = sld [smem:[#allocation2]] (!%p210_p3) }
   0xc   : > { %v267_v0 = vld [vmem:[%s1270_s2 + $0x10] sm:$0xff]  ;;  %v1043_v1 = vmov 0   ;;  %v265_v2 = vld [vmem:[%s1270_s2] sm:$0xff]  ;;  %s1279_s23 = smov (!%p244_p4, %s841_s23), 15  ;;  %v268_v5 = vld [vmem:[%s1270_s2 + $0x18] sm:$0xff]  ;;  %vm317_vm0 = vcmask 261120  }
   0xd   : > { %1017 = vset.pattern.permute.xlu0 %v1043_v1  ;;  %1018 = vset.pattern.permute.xlu1 %v1043_v1  ;;  %s971_s28 = sshll.u32 %s1279_s23, 4  ;;  %v266_v6 = vld [vmem:[%s1270_s2 + $0x8] sm:$0xff]  ;;  %v1123_v10 = vld [vmem:[%s1269_s1] sm:$0xff]  ;;  %s1281_s20 = smov (!%p253_p5, %s1033_s20), 1 }
   0xe   : > { %287 = vperm.xlu0 %1017, %v267_v0   ;;  %277 = vperm.xlu1 %1018, %v265_v2   ;;  %s1107_s6 = scalar_lea.vmem %s1268_s0, %s971_s28  ;;  %v1128_v11 = vld [vmem:[%s1269_s1 + $0x8] sm:$0xff]  ;;  %v1159_v37 = vld [vmem:[%s1271_s3] sm:$0x1]  ;;  %s844_s18 = sshll.u32 %s1281_s20, 3  ;;  %v1188_v0 = vstv %s270_s17 }
   0xf   : > { %v975_v3 = vld [vmem:[%s1107_s6 + $0x8] sm:$0xff]  ;;  %v977_v4 = vld [vmem:[%s1107_s6 + $0x18] sm:$0xff]  ;;  %v974_v7 = vld [vmem:[%s1107_s6] sm:$0xff]  ;;  %s1193_s24 = scalar_lea.vmem %s1273_s5, %s844_s18 }
  0x10   : > { %330 = vmatpush.bf16.msra.mxu0 %v975_v3  ;;  %990 = vmatpush.bf16.msra.mxu3 %v975_v3  ;;  %v976_v8 = vld [vmem:[%s1107_s6 + $0x10] sm:$0xff]  ;;  %v981_v9 = vld [vmem:[%s1107_s6 + $0x38] sm:$0xff]  ;;  %v979_v33 = vld [vmem:[%s1107_s6 + $0x28] sm:$0xff] }
  0x11   : > { %390 = vmatpush.bf16.msra.mxu2 %v977_v4  ;;  %v980_v12 = vld [vmem:[%s1107_s6 + $0x30] sm:$0xff]  ;;  %v978_v38 = vld [vmem:[%s1107_s6 + $0x20] sm:$0xff]  ;;  %v985_v61 = vld [vmem:[%s1107_s6 + $0x58] sm:$0xff] }
  0x12   : > { %v984_v63 = vld [vmem:[%s1107_s6 + $0x50] sm:$0xff] }
  0x14   : > { %331 = vmatpush.bf16.msra.mxu0 %v974_v7  ;;  %991 = vmatpush.bf16.msra.mxu3 %v974_v7 }
  0x15   : > { %391 = vmatpush.bf16.msra.mxu2 %v976_v8 }
  0x16   : > { %292 = vperm.xlu0 %1017, %v268_v5   ;;  %282 = vperm.xlu1 %1018, %v266_v6  }
  0x17   : > { %861 = vmatmul.msk.bf16.vlgmr.msra.gmra.mxu0 %vm317_vm0, %v1123_v10  ;;  %862 = vmatmul.msk.bf16.vlgmr.msra.gmra.mxu3 %vm317_vm0, %v1128_v11 }
  0x18   : > { %502 = vmatpush.bf16.msrb.mxu0 %v981_v9  ;;  %876 = vmatmul.msk.bf16.vlgmr.msra.gmra.mxu2 %vm317_vm0, %v1123_v10 }
  0x1c   : > { %503 = vmatpush.bf16.msrb.mxu0 %v980_v12 }
  0x27   : > { %906 = vmatmul.msk.bf16.vlgmr.msrb.gmra.mxu0 %vm317_vm0, %v1123_v10 }
  0x28   : > { %877 = vmatmul.msk.bf16.gmra.mxu2 %vm317_vm0, %v1128_v11 }
  0x37   : > { %907 = vmatmul.msk.bf16.gmra.mxu0 %vm317_vm0, %v1128_v11 }
  0x80   : > { %v1143_v14 = vpop.permute.xlu1 %277  ;;  %v1145_v15 = vpop.permute.xlu0 %287 }
  0x88   : > { %v1147_v19 = vpop.permute.xlu1 %282  ;;  %v1150_v21 = vpop.permute.xlu0 %292 }
  0x94   : > { %v333_v13 = vpop.f32.mrf.mxu0 }
  0x95   : > { %v334_v25 = vadd.f32 %v333_v13, %v1143_v14 }
  0x97   : > { %v343_v31 = vmax.f32 %v334_v25, 0.0 }
  0x9a   : > { %v338_v16 = vpop.f32.mrf.mxu3 }
  0x9b   : > { %v393_v17 = vpop.f32.mrf.mxu2  ;;  %v339_v20 = vadd.f32 %v338_v16, %v1145_v15 }
  0x9c   : > { %v335_v18 = vpop.f32.mrf.mxu0  ;;  %v394_v44 = vadd.f32 %v393_v17, %v1143_v14 }
  0x9d   : > { %v336_v26 = vadd.f32 %v335_v18, %v1147_v19  ;;  %v345_v28 = vmax.f32 %v339_v20, 0.0 }
  0x9e   : > { %v403_v49 = vmax.f32 %v394_v44, 0.0 }
  0x9f   : > { %v344_v32 = vmax.f32 %v336_v26, 0.0 }
  0xa1   : > { %v347_v35 = vpack.c.bf16 %v344_v32, %v343_v31 }
  0xa2   : > { %v340_v22 = vpop.f32.mrf.mxu3 }
  0xa3   : > { %v341_v23 = vadd.f32 %v340_v22, %v1150_v21  ;;  %v395_v24 = vpop.f32.mrf.mxu2 }
  0xa4   : > { %v505_v27 = vpop.f32.mrf.mxu0  ;;  %v396_v41 = vadd.f32 %v395_v24, %v1147_v19 }
  0xa5   : > { %v346_v29 = vmax.f32 %v341_v23, 0.0  ;;  %v506_v55 = vadd.f32 %v505_v27, %v1143_v14  ;;  %v983_v27 = vld [vmem:[%s1107_s6 + $0x48] sm:$0xff] }
  0xa6   : > { %v404_v47 = vmax.f32 %v396_v41, 0.0 }
  0xa7   : > { %v348_v30 = vpack.c.bf16 %v346_v29, %v345_v28  ;;  %v515_v60 = vmax.f32 %v506_v55, 0.0  ;;  %v982_v29 = vld [vmem:[%s1107_s6 + $0x40] sm:$0xff] }
  0xa8   : > { %v407_v52 = vpack.c.bf16 %v404_v47, %v403_v49 }
  0xa9   : > { %359 = vmatpush.bf16.msra.mxu1 %v348_v30 }
  0xab   : > { %v398_v34 = vpop.f32.mrf.mxu2 }
  0xac   : > { %v507_v36 = vpop.f32.mrf.mxu0  ;;  %v399_v39 = vadd.f32 %v398_v34, %v1145_v15 }
  0xad   : > { %360 = vmatpush.bf16.msra.mxu1 %v347_v35  ;;  %v508_v53 = vadd.f32 %v507_v36, %v1147_v19 }
  0xae   : > { %v405_v45 = vmax.f32 %v399_v39, 0.0 }
  0xaf   : > { %v516_v58 = vmax.f32 %v508_v53, 0.0 }
  0xb0   : > { %863 = vmatmul.msk.bf16.vlgmr.msra.gmra.mxu1 %vm317_vm0, %v1159_v37 }
  0xb1   : > { %446 = vmatpush.bf16.msrb.mxu1 %v979_v33  ;;  %v519_v62 = vpack.c.bf16 %v516_v58, %v515_v60 }
  0xb3   : > { %v400_v40 = vpop.f32.mrf.mxu2 }
  0xb4   : > { %v401_v42 = vadd.f32 %v400_v40, %v1150_v21  ;;  %v510_v43 = vpop.f32.mrf.mxu0 }
  0xb5   : > { %447 = vmatpush.bf16.msrb.mxu1 %v978_v38  ;;  %v511_v50 = vadd.f32 %v510_v43, %v1145_v15  ;;  %v989_v43 = vld [vmem:[%s1107_s6 + $0x78] sm:$0xff] }
  0xb6   : > { %v406_v46 = vmax.f32 %v401_v42, 0.0 }
  0xb7   : > { %v517_v56 = vmax.f32 %v511_v50, 0.0 }
  0xb8   : > { %v408_v48 = vpack.c.bf16 %v406_v46, %v405_v45  ;;  %v988_v45 = vld [vmem:[%s1107_s6 + $0x70] sm:$0xff] }
  0xba   : > { %415 = vmatpush.bf16.msrb.mxu3 %v408_v48 }
  0xbc   : > { %v512_v51 = vpop.f32.mrf.mxu0 }
  0xbd   : > { %v513_v54 = vadd.f32 %v512_v51, %v1150_v21 }
  0xbe   : > { %416 = vmatpush.bf16.msrb.mxu3 %v407_v52 }
  0xbf   : > { %v518_v57 = vmax.f32 %v513_v54, 0.0 }
  0xc0   : > { %891 = vmatmul.msk.bf16.vlgmr.msrb.gmra.mxu1 %vm317_vm0, %v1123_v10 }
  0xc1   : > { %v520_v59 = vpack.c.bf16 %v518_v57, %v517_v56  ;;  %878 = vmatmul.msk.bf16.vlgmr.msrb.gmra.mxu3 %vm317_vm0, %v1159_v37 }
  0xc3   : > { %527 = vmatpush.bf16.msrb.mxu2 %v520_v59 }
  0xc7   : > { %528 = vmatpush.bf16.msrb.mxu2 %v519_v62 }
  0xca   : > { %908 = vmatmul.msk.bf16.vlgmr.msrb.gmra.mxu2 %vm317_vm0, %v1159_v37 }
  0xcb   : > { %614 = vmatpush.bf16.msra.mxu2 %v985_v61 }
  0xcf   : > { %615 = vmatpush.bf16.msra.mxu2 %v984_v63 }
  0xd0   : > { %892 = vmatmul.msk.bf16.gmra.mxu1 %vm317_vm0, %v1128_v11 }
  0xda   : > { %936 = vmatmul.msk.bf16.vlgmr.msra.gmra.mxu2 %vm317_vm0, %v1123_v10 }
  0xea   : > { %937 = vmatmul.msk.bf16.gmra.mxu2 %vm317_vm0, %v1128_v11 }
 0x12d   : > { %v362_v1 = vpop.f32.mrf.mxu1 }
 0x12e   : > { %v363_v2 = vadd.f32 %v362_v1, %v1188_v0 }
 0x130   : > { %366 = vst [vmem:[%s1193_s24] sm:$0x1] %v363_v2 }
 0x135   : > { %v364_v3 = vpop.f32.mrf.mxu1 }
 0x13d   : > { %v449_v4 = vpop.f32.mrf.mxu1 }
 0x13e   : > { %v450_v18 = vadd.f32 %v449_v4, %v1143_v14 }
 0x140   : > { %v459_v25 = vmax.f32 %v450_v18, 0.0 }
 0x144   : > { %v418_v46 = vpop.f32.mrf.mxu3 }
 0x145   : > { %v451_v5 = vpop.f32.mrf.mxu1  ;;  %v419_v47 = vadd.f32 %v418_v46, %v1188_v0 }
 0x146   : > { %v452_v16 = vadd.f32 %v451_v5, %v1147_v19 }
 0x147   : > { %422 = vst [vmem:[%s1193_s24 + $0x1] sm:$0x1] %v419_v47 }
 0x148   : > { %v460_v23 = vmax.f32 %v452_v16, 0.0 }
 0x14a   : > { %v463_v28 = vpack.c.bf16 %v460_v23, %v459_v25 }
 0x14c   : > { %v420_v48 = vpop.f32.mrf.mxu3 }
 0x14d   : > { %v454_v6 = vpop.f32.mrf.mxu1  ;;  %v530_v7 = vpop.f32.mrf.mxu2 }
 0x14e   : > { %v531_v8 = vadd.f32 %v530_v7, %v1188_v0  ;;  %v455_v9 = vadd.f32 %v454_v6, %v1145_v15  ;;  %v987_v6 = vld [vmem:[%s1107_s6 + $0x68] sm:$0xff] }
 0x150   : > { %534 = vst [vmem:[%s1193_s24 + $0x3] sm:$0x1] %v531_v8  ;;  %v461_v20 = vmax.f32 %v455_v9, 0.0  ;;  %v986_v9 = vld [vmem:[%s1107_s6 + $0x60] sm:$0xff] }
 0x155   : > { %v456_v12 = vpop.f32.mrf.mxu1  ;;  %v532_v13 = vpop.f32.mrf.mxu2 }
 0x156   : > { %v457_v17 = vadd.f32 %v456_v12, %v1150_v21 }
 0x158   : > { %v462_v22 = vmax.f32 %v457_v17, 0.0 }
 0x15a   : > { %v464_v24 = vpack.c.bf16 %v462_v22, %v461_v20 }
 0x15c   : > { %471 = vmatpush.bf16.msra.mxu3 %v464_v24 }
 0x15d   : > { %v617_v26 = vpop.f32.mrf.mxu2 }
 0x15e   : > { %v618_v36 = vadd.f32 %v617_v26, %v1143_v14 }
 0x160   : > { %472 = vmatpush.bf16.msra.mxu3 %v463_v28  ;;  %v627_v42 = vmax.f32 %v618_v36, 0.0 }
 0x163   : > { %893 = vmatmul.msk.bf16.vlgmr.msra.gmra.mxu3 %vm317_vm0, %v1159_v37 }
 0x164   : > { %558 = vmatpush.bf16.msrb.mxu3 %v983_v27 }
 0x165   : > { %v619_v30 = vpop.f32.mrf.mxu2 }
 0x166   : > { %v620_v34 = vadd.f32 %v619_v30, %v1147_v19 }
 0x168   : > { %559 = vmatpush.bf16.msrb.mxu3 %v982_v29  ;;  %v628_v40 = vmax.f32 %v620_v34, 0.0 }
 0x16a   : > { %v631_v44 = vpack.c.bf16 %v628_v40, %v627_v42 }
 0x16d   : > { %v622_v31 = vpop.f32.mrf.mxu2 }
 0x16e   : > { %v623_v32 = vadd.f32 %v622_v31, %v1145_v15 }
 0x170   : > { %v629_v38 = vmax.f32 %v623_v32, 0.0 }
 0x173   : > { %921 = vmatmul.msk.bf16.vlgmr.msrb.gmra.mxu3 %vm317_vm0, %v1123_v10 }
 0x175   : > { %v624_v33 = vpop.f32.mrf.mxu2 }
 0x176   : > { %v625_v35 = vadd.f32 %v624_v33, %v1150_v21 }
 0x178   : > { %v630_v39 = vmax.f32 %v625_v35, 0.0 }
 0x17a   : > { %v632_v41 = vpack.c.bf16 %v630_v39, %v629_v38 }
 0x17c   : > { %639 = vmatpush.bf16.msra.mxu0 %v632_v41 }
 0x180   : > { %640 = vmatpush.bf16.msra.mxu0 %v631_v44 }
 0x183   : > { %922 = vmatmul.msk.bf16.gmra.mxu3 %vm317_vm0, %v1128_v11  ;;  %938 = vmatmul.msk.bf16.vlgmr.msra.gmra.mxu0 %vm317_vm0, %v1159_v37 }
 0x184   : > { %726 = vmatpush.bf16.msrb.mxu0 %v989_v43 }
 0x188   : > { %727 = vmatpush.bf16.msrb.mxu0 %v988_v45 }
 0x193   : > { %966 = vmatmul.msk.bf16.vlgmr.msrb.gmra.mxu0 %vm317_vm0, %v1123_v10 }
 0x1a3   : > { %967 = vmatmul.msk.bf16.gmra.mxu0 %vm317_vm0, %v1128_v11 }
 0x1e6   : > { %v474_v49 = vpop.f32.mrf.mxu3 }
 0x1e7   : > { %v475_v50 = vadd.f32 %v474_v49, %v1188_v0 }
 0x1e9   : > { %478 = vst [vmem:[%s1193_s24 + $0x2] sm:$0x1] %v475_v50 }
 0x1ee   : > { %v476_v51 = vpop.f32.mrf.mxu3 }
 0x1f6   : > { %v561_v52 = vpop.f32.mrf.mxu3 }
 0x1f7   : > { %v562_v63 = vadd.f32 %v561_v52, %v1143_v14 }
 0x1f9   : > { %v571_v5 = vmax.f32 %v562_v63, 0.0 }
 0x1fe   : > { %v563_v53 = vpop.f32.mrf.mxu3 }
 0x1ff   : > { %v564_v60 = vadd.f32 %v563_v53, %v1147_v19 }
 0x200   : > { %v642_v54 = vpop.f32.mrf.mxu0 }
 0x201   : > { %v643_v55 = vadd.f32 %v642_v54, %v1188_v0  ;;  %v572_v3 = vmax.f32 %v564_v60, 0.0 }
 0x203   : > { %646 = vst [vmem:[%s1193_s24 + $0x5] sm:$0x1] %v643_v55  ;;  %v575_v7 = vpack.c.bf16 %v572_v3, %v571_v5 }
 0x206   : > { %v566_v56 = vpop.f32.mrf.mxu3 }
 0x207   : > { %v567_v58 = vadd.f32 %v566_v56, %v1145_v15 }
 0x208   : > { %v644_v57 = vpop.f32.mrf.mxu0 }
 0x209   : > { %v573_v1 = vmax.f32 %v567_v58, 0.0 }
 0x20e   : > { %v568_v59 = vpop.f32.mrf.mxu3 }
 0x20f   : > { %v569_v61 = vadd.f32 %v568_v59, %v1150_v21 }
 0x210   : > { %v729_v62 = vpop.f32.mrf.mxu0 }
 0x211   : > { %v574_v2 = vmax.f32 %v569_v61, 0.0  ;;  %v730_v20 = vadd.f32 %v729_v62, %v1143_v14 }
 0x213   : > { %v576_v4 = vpack.c.bf16 %v574_v2, %v573_v1  ;;  %v739_v26 = vmax.f32 %v730_v20, 0.0 }
 0x215   : > { %583 = vmatpush.bf16.msra.mxu1 %v576_v4 }
 0x218   : > { %v731_v8 = vpop.f32.mrf.mxu0 }
 0x219   : > { %584 = vmatpush.bf16.msra.mxu1 %v575_v7  ;;  %v732_v17 = vadd.f32 %v731_v8, %v1147_v19 }
 0x21b   : > { %v740_v24 = vmax.f32 %v732_v17, 0.0 }
 0x21c   : > { %923 = vmatmul.msk.bf16.vlgmr.msra.gmra.mxu1 %vm317_vm0, %v1159_v37 }
 0x21d   : > { %670 = vmatpush.bf16.msrb.mxu1 %v987_v6  ;;  %v743_v27 = vpack.c.bf16 %v740_v24, %v739_v26 }
 0x220   : > { %v734_v12 = vpop.f32.mrf.mxu0 }
 0x221   : > { %671 = vmatpush.bf16.msrb.mxu1 %v986_v9  ;;  %v735_v13 = vadd.f32 %v734_v12, %v1145_v15 }
 0x223   : > { %v741_v22 = vmax.f32 %v735_v13, 0.0 }
 0x228   : > { %v736_v16 = vpop.f32.mrf.mxu0 }
 0x229   : > { %v737_v18 = vadd.f32 %v736_v16, %v1150_v21 }
 0x22b   : > { %v742_v23 = vmax.f32 %v737_v18, 0.0 }
 0x22c   : > { %951 = vmatmul.msk.bf16.vlgmr.msrb.gmra.mxu1 %vm317_vm0, %v1123_v10 }
 0x22d   : > { %v744_v25 = vpack.c.bf16 %v742_v23, %v741_v22 }
 0x22f   : > { %751 = vmatpush.bf16.msrb.mxu2 %v744_v25 }
 0x233   : > { %752 = vmatpush.bf16.msrb.mxu2 %v743_v27 }
 0x236   : > { %968 = vmatmul.msk.bf16.vlgmr.msrb.gmra.mxu2 %vm317_vm0, %v1159_v37 }
 0x23c   : > { %952 = vmatmul.msk.bf16.gmra.mxu1 %vm317_vm0, %v1128_v11 }
 0x299   : > { %v586_v28 = vpop.f32.mrf.mxu1 }
 0x29a   : > { %v587_v29 = vadd.f32 %v586_v28, %v1188_v0 }
 0x29c   : > { %590 = vst [vmem:[%s1193_s24 + $0x4] sm:$0x1] %v587_v29 }
 0x2a1   : > { %v588_v30 = vpop.f32.mrf.mxu1 }
 0x2a9   : > { %v673_v31 = vpop.f32.mrf.mxu1 }
 0x2aa   : > { %v674_v38 = vadd.f32 %v673_v31, %v1143_v14 }
 0x2ac   : > { %v683_v42 = vmax.f32 %v674_v38, 0.0 }
 0x2b1   : > { %v675_v32 = vpop.f32.mrf.mxu1 }
 0x2b2   : > { %v676_v35 = vadd.f32 %v675_v32, %v1147_v19 }
 0x2b4   : > { %v684_v40 = vmax.f32 %v676_v35, 0.0 }
 0x2b6   : > { %v687_v43 = vpack.c.bf16 %v684_v40, %v683_v42 }
 0x2b9   : > { %v678_v10 = vpop.f32.mrf.mxu1 }
 0x2ba   : > { %v679_v33 = vadd.f32 %v678_v10, %v1145_v15  ;;  %v754_v15 = vpop.f32.mrf.mxu2 }
 0x2bb   : > { %v755_v19 = vadd.f32 %v754_v15, %v1188_v0 }
 0x2bc   : > { %v685_v11 = vmax.f32 %v679_v33, 0.0 }
 0x2bd   : > { %758 = vst [vmem:[%s1193_s24 + $0x7] sm:$0x1] %v755_v19 }
 0x2c1   : > { %v680_v34 = vpop.f32.mrf.mxu1 }
 0x2c2   : > { %v681_v36 = vadd.f32 %v680_v34, %v1150_v21  ;;  %v756_v44 = vpop.f32.mrf.mxu2 }
 0x2c4   : > { %v686_v39 = vmax.f32 %v681_v36, 0.0 }
 0x2c6   : > { %v688_v41 = vpack.c.bf16 %v686_v39, %v685_v11 }
 0x2c8   : > { %695 = vmatpush.bf16.msra.mxu3 %v688_v41 }
 0x2cc   : > { %696 = vmatpush.bf16.msra.mxu3 %v687_v43 }
 0x2cf   : > { %953 = vmatmul.msk.bf16.vlgmr.msra.gmra.mxu3 %vm317_vm0, %v1159_v37 }
 0x352   : > { %v698_v21 = vpop.f32.mrf.mxu3 }
 0x353   : > { %v699_v14 = vadd.f32 %v698_v21, %v1188_v0 }
 0x355   : > { %702 = vst [vmem:[%s1193_s24 + $0x6] sm:$0x1] %v699_v14 }
 0x35a   : > { %v700_v45 = vpop.f32.mrf.mxu3 }
 0x35b PF: > { %s16_s22 = sadd.s32 1, %s1041_s22   ;;  %s1274_s20 = smov %s1037_s21 }
 0x35c   : > { %p13_p6 = scmp.ge.s32.totalorder %s16_s22, 4   ;;  %s1275_s21 = smov %s1277_s4 }
 0x35e   :  { %15 = sbr.rel (!%p13_p6) target bundleno = 2 (0x2), region = 77 }

// kernel: _lambda_.2
= control target key start
LH: loop header
LB: loop body
LE: loop exit
PB: predicated region body
PF: predicated region fallthrough
CT: control target
= control target key end

     0   :  { %8 = vsyncpa [#allocation3], 0  ;;  %s1852_s0 = inlined_call_operand.vmem [shape: bf16[16,128], index: 0, kind: input, shape index: {}]   ;;  %s1853_s1 = inlined_call_operand.hbm [shape: bf16[128,4096], index: 1, kind: input, shape index: {}]   ;;  %s1854_s2 = inlined_call_operand.hbm [shape: f32[1,4096], index: 2, kind: input, shape index: {}]   ;;  %s1855_s3 = inlined_call_operand.vmem [shape: bf16[16,4096], index: 3, kind: output, shape index: {}]  }
   0x1   :  { %10 = vsyncpa [#allocation3 + $0x1], 0 }
   0x2   :  { %11 = vsyncpa [#allocation5], 0 }
   0x3   :  { %13 = vsyncpa [#allocation5 + $0x1], 0  ;;  %s1556_s12 = smov 0   ;;  %s1558_s13 = smov 0  }
   0x4   :  { %s1560_s14 = smov 0   ;;  %s1562_s15 = smov 0  }
   0x5   :  { %s1564_s16 = smov 0   ;;  %s1566_s17 = smov 0  }
   0x6 LB: > { %s1008_s18 = sadd.s32 4294967295, %s1531_s17   ;;  %s34_s19 = sadd.s32 1, %s1527_s16  ;;  %s1531_s17 = sphi %s1566_s17, %s19_s17   ;;  %s1527_s16 = sphi %s1564_s16, %s1864_s16   ;;  %s1523_s15 = sphi %s1562_s15, %s1863_s15   ;;  %s1519_s14 = sphi %s1560_s14, %s1862_s14   ;;  %s1515_s13 = sphi %s1558_s13, %s1861_s13   ;;  %s1511_s12 = sphi %s1556_s12, %s1860_s12  }
   0x7   : > { %p36_p0 = scmp.ge.s32.totalorder %s34_s19, 4  ;;  %s75_s20 = sadd.s32 1, %s1519_s14 }
   0x8   : > { %p82_p1 = scmp.ne.s32.totalorder %s1519_s14, %s1515_s13  ;;  %p83_p2 = scmp.eq.s32.totalorder %s1531_s17, 0 }
   0x9   : > { %s1866_s19 = smov (%p36_p0, %s34_s19), 0  ;;  %p88_p4 = scmp.ne.s32.totalorder %s1515_s13, %s1511_s12 }
   0xa   : > { %p1592_p3 = por %p83_p2, %p82_p1  ;;  %s71_s22 = ssub.s32 %s1527_s16, %s1866_s19 }
   0xb   : > { %p89_p5 = scmp.eq.s32.totalorder %s1008_s18, 0  ;;  %p73_p6 = scmp.eq.s32.totalorder %s71_s22, 0 }
   0xc   : > { %p140_p7 = scmp.eq.s32.totalorder %s1008_s18, 3  ;;  %p1365_p10 = scmp.lt.s32.totalorder %s1531_s17, 4 }
   0xd   : > { %p1599_p8 = por %p89_p5, %p88_p4  ;;  %s1612_s26 = sand.u32 1, %s1519_s14  }
   0xe   : > { %s1604_s24 = scalar_select %p73_p6, %s1519_s14, %s75_s20  }
   0xf   : > { %p1606_p9 = por %p140_p7, %p82_p1  ;;  %s1287_s27 = sshll.u32 %s1527_s16, 5 }
  0x10   : > { %s1013_s28 = sshll.u32 %s1612_s26, 9  ;;  %s190_s4 = scalar_lea.hbm %s1853_s1, %s1287_s27 }
  0x11   : > { %s191_s5 = sshll.u32 %s190_s4, 4  ;;  %s182_s6 = scalar_lea.vmem [#allocation2], %s1013_s28  ;;  %s192_s5 = int_to_ptr.hbm [resolvable:$true] %s191_s5 }
  0x12   : > { %s193_s7 = sshll.u32 %s182_s6, 4  ;;  %p1621_p11 = pnand %p1365_p10, %p1592_p3  ;;  %s194_s7 = int_to_ptr.vmem [resolvable:$true] %s193_s7 }
  0x13   : > { %p1018_p12 = scmp.ge.s32.totalorder %s1531_s17, 1  ;;  %s179_s9 = scalar_lea.sflag [#allocation3], %s1612_s26 }
  0x14   : > { %s1533_s10 = smov 2048   ;;  %s1534_s11 = smov 512  }
  0x15   : > { %s1535_s12 = smov 32   ;;  %p220_p13 = scmp.lt.s32.totalorder %s1531_s17, 5 }
  0x16   : > { %1361 = dma.hbm_to_vmem [thread:$0]  (!%p1621_p11), %s192_s5, 8192, %s194_s7, %s179_s9, %s1533_s10, %s1534_s11, %s1535_s12  }
  0x17   : > { %s1016_s18 = sshll.u32 %s1612_s26, 3  ;;  %s1017_s20 = sshll.u32 %s1527_s16, 3 }
  0x18   : > { %p221_p0 = pnand %p1018_p12, %p220_p13  ;;  %s211_s27 = scalar_lea.hbm %s1854_s2, %s1017_s20 }
  0x19   : > { %s207_s28 = scalar_lea.vmem [#allocation4], %s1016_s18  ;;  %s213_s30 = sshll.u32 %s211_s27, 4  ;;  %s214_s30 = int_to_ptr.hbm [resolvable:$true] %s213_s30 }
  0x1a   : > { %s215_s29 = sshll.u32 %s207_s28, 4  ;;  %s204_s4 = scalar_lea.sflag [#allocation5], %s1612_s26  ;;  %s216_s29 = int_to_ptr.vmem [resolvable:$true] %s215_s29 }
  0x1b   : > { %1364 = dma.hbm_to_vmem [thread:$0]  (!%p1621_p11), %s214_s30, 128, %s216_s29, %s204_s4  }
  0x1c   : > { %224 = sbr.rel (%p221_p0) target bundleno = 261 (0x105), region = 32  ;;  %s1639_s5 = sand.u32 (!%p221_p0), 1, %s1515_s13  }
  0x1d   : > { %s1019_s6 = sshll.u32 (!%p221_p0), %s1639_s5, 9  ;;  %s227_s7 = scalar_lea.sflag (!%p221_p0), [#allocation3], %s1639_s5 }
  0x1e   : > { %s1643_s9 = scalar_lea.vmem (!%p221_p0), [#allocation2], %s1019_s6 }
  0x21   : > { %1502 = dma.done.wait (%p1599_p8), %s227_s7, 8192  }
  0x22   : > { %1504 = vsyncadd (%p1599_p8), %s227_s7, 4294959104  ;;  %s1020_s26 = sshll.u32 %s1639_s5, 3  ;;  %s237_s8 = scalar_lea.sflag [#allocation5], %s1639_s5 }
  0x23   : > { %s1651_s10 = scalar_lea.vmem [#allocation4], %s1020_s26 }
  0x24   : > { %1506 = dma.done.wait (%p1599_p8), %s237_s8, 128  }
  0x25   : > { %1508 = vsyncadd (%p1599_p8), %s237_s8, 4294967168  ;;  %v1252_v0 = vld [vmem:[%s1643_s9 + $0x1c0] sm:$0xf]  ;;  %v1345_v2 = vld [vmem:[%s1643_s9 + $0x1c4] sm:$0xf]  ;;  %s1021_s12 = sshll.u32 %s1639_s5, 6 }
  0x26   : > { %v1349_v1 = vld [vmem:[%s1643_s9 + $0x1dc] sm:$0xf0]  ;;  %v1254_v4 = vld [vmem:[%s1643_s9 + $0x1e0] sm:$0xf0]  ;;  %v1260_v5 = vld [vmem:[%s1643_s9 + $0x1c8] sm:$0xf] }
  0x27   : > { %v1253_v3 = vor.u32 %v1349_v1, %v1252_v0  ;;  %v1350_v6 = vld [vmem:[%s1643_s9 + $0x1e4] sm:$0xf0]  ;;  %v1257_v7 = vor.u32 %v1345_v2, %v1254_v4  ;;  %v1346_v9 = vld [vmem:[%s1643_s9 + $0x1cc] sm:$0xf]  ;;  %v1220_v11 = vld [vmem:[%s1643_s9 + $0x180] sm:$0xf] }
  0x28   : > { %v1261_v8 = vor.u32 %v1350_v6, %v1260_v5  ;;  %v1262_v10 = vld [vmem:[%s1643_s9 + $0x1e8] sm:$0xf0]  ;;  %v1341_v13 = vld [vmem:[%s1643_s9 + $0x19c] sm:$0xf0]  ;;  %v1337_v14 = vld [vmem:[%s1643_s9 + $0x184] sm:$0xf] }
  0x29   : > { %700 = vmatpush.bf16.msra.mxu0 %v1253_v3  ;;  %v1265_v12 = vor.u32 %v1346_v9, %v1262_v10  ;;  %v1222_v15 = vld [vmem:[%s1643_s9 + $0x1a0] sm:$0xf0]  ;;  %714 = vmatpush.bf16.msra.mxu1 %v1257_v7  ;;  %v1221_v16 = vor.u32 %v1341_v13, %v1220_v11  ;;  %v1228_v18 = vld [vmem:[%s1643_s9 + $0x188] sm:$0xf]  ;;  %v1338_v20 = vld [vmem:[%s1643_s9 + $0x18c] sm:$0xf] }
  0x2a   : > { %728 = vmatpush.bf16.msra.mxu2 %v1261_v8  ;;  %v1225_v17 = vor.u32 %v1337_v14, %v1222_v15  ;;  %v1342_v19 = vld [vmem:[%s1643_s9 + $0x1a4] sm:$0xf0]  ;;  %v1230_v22 = vld [vmem:[%s1643_s9 + $0x1a8] sm:$0xf0]  ;;  %v1188_v23 = vld [vmem:[%s1643_s9 + $0x140] sm:$0xf] }
  0x2b   : > { %742 = vmatpush.bf16.msra.mxu3 %v1265_v12  ;;  %v1229_v21 = vor.u32 %v1342_v19, %v1228_v18  ;;  %v1333_v24 = vld [vmem:[%s1643_s9 + $0x15c] sm:$0xf0]  ;;  %v1233_v25 = vor.u32 %v1338_v20, %v1230_v22  ;;  %v1329_v26 = vld [vmem:[%s1643_s9 + $0x144] sm:$0xf]  ;;  %v1196_v28 = vld [vmem:[%s1643_s9 + $0x148] sm:$0xf] }
  0x2c   : > { %v1190_v27 = vld [vmem:[%s1643_s9 + $0x160] sm:$0xf0]  ;;  %v1189_v29 = vor.u32 %v1333_v24, %v1188_v23  ;;  %v1334_v30 = vld [vmem:[%s1643_s9 + $0x164] sm:$0xf0]  ;;  %v1330_v31 = vld [vmem:[%s1643_s9 + $0x14c] sm:$0xf] }
  0x2d   : > { %701 = vmatpush.bf16.msra.mxu0 %v1221_v16  ;;  %v1198_v32 = vld [vmem:[%s1643_s9 + $0x168] sm:$0xf0]  ;;  %715 = vmatpush.bf16.msra.mxu1 %v1225_v17  ;;  %v1193_v33 = vor.u32 %v1329_v26, %v1190_v27  ;;  %v1197_v34 = vor.u32 %v1334_v30, %v1196_v28  ;;  %v1156_v35 = vld [vmem:[%s1643_s9 + $0x100] sm:$0xf]  ;;  %v1321_v37 = vld [vmem:[%s1643_s9 + $0x104] sm:$0xf] }
  0x2e   : > { %729 = vmatpush.bf16.msra.mxu2 %v1229_v21  ;;  %v1325_v36 = vld [vmem:[%s1643_s9 + $0x11c] sm:$0xf0]  ;;  %v1201_v38 = vor.u32 %v1330_v31, %v1198_v32  ;;  %v1158_v39 = vld [vmem:[%s1643_s9 + $0x120] sm:$0xf0]  ;;  %v1164_v40 = vld [vmem:[%s1643_s9 + $0x108] sm:$0xf] }
  0x2f   : > { %743 = vmatpush.bf16.msra.mxu3 %v1233_v25  ;;  %v1326_v41 = vld [vmem:[%s1643_s9 + $0x124] sm:$0xf0]  ;;  %v1322_v42 = vld [vmem:[%s1643_s9 + $0x10c] sm:$0xf]  ;;  %v1157_v44 = vor.u32 %v1325_v36, %v1156_v35  ;;  %v1161_v45 = vor.u32 %v1321_v37, %v1158_v39  ;;  %v1124_v47 = vld [vmem:[%s1643_s9 + $0xc0] sm:$0xf] }
  0x30   : > { %v1166_v43 = vld [vmem:[%s1643_s9 + $0x128] sm:$0xf0]  ;;  %v1165_v46 = vor.u32 %v1326_v41, %v1164_v40  ;;  %v1317_v48 = vld [vmem:[%s1643_s9 + $0xdc] sm:$0xf0]  ;;  %v1313_v49 = vld [vmem:[%s1643_s9 + $0xc4] sm:$0xf] }
  0x31   : > { %702 = vmatpush.bf16.msra.mxu0 %v1189_v29  ;;  %716 = vmatpush.bf16.msra.mxu1 %v1193_v33  ;;  %v1169_v50 = vor.u32 %v1322_v42, %v1166_v43  ;;  %v1126_v51 = vld [vmem:[%s1643_s9 + $0xe0] sm:$0xf0]  ;;  %v1132_v52 = vld [vmem:[%s1643_s9 + $0xc8] sm:$0xf]  ;;  %v1314_v54 = vld [vmem:[%s1643_s9 + $0xcc] sm:$0xf]  ;;  %v1125_v56 = vor.u32 %v1317_v48, %v1124_v47 }
  0x32   : > { %730 = vmatpush.bf16.msra.mxu2 %v1197_v34  ;;  %v1318_v53 = vld [vmem:[%s1643_s9 + $0xe4] sm:$0xf0]  ;;  %v1134_v55 = vld [vmem:[%s1643_s9 + $0xe8] sm:$0xf0]  ;;  %v1129_v57 = vor.u32 %v1313_v49, %v1126_v51  ;;  %v1092_v59 = vld [vmem:[%s1643_s9 + $0x80] sm:$0xf] }
  0x33   : > { %744 = vmatpush.bf16.msra.mxu3 %v1201_v38  ;;  %v1133_v58 = vor.u32 %v1318_v53, %v1132_v52  ;;  %v1309_v60 = vld [vmem:[%s1643_s9 + $0x9c] sm:$0xf0]  ;;  %v1305_v61 = vld [vmem:[%s1643_s9 + $0x84] sm:$0xf]  ;;  %v1137_v62 = vor.u32 %v1314_v54, %v1134_v55  ;;  %v1100_v0 = vld [vmem:[%s1643_s9 + $0x88] sm:$0xf] }
  0x34   : > { %v1094_v63 = vld [vmem:[%s1643_s9 + $0xa0] sm:$0xf0]  ;;  %v1310_v1 = vld [vmem:[%s1643_s9 + $0xa4] sm:$0xf0]  ;;  %v1306_v2 = vld [vmem:[%s1643_s9 + $0x8c] sm:$0xf]  ;;  %v1093_v4 = vor.u32 %v1309_v60, %v1092_v59 }
  0x35   : > { %703 = vmatpush.bf16.msra.mxu0 %v1157_v44  ;;  %717 = vmatpush.bf16.msra.mxu1 %v1161_v45  ;;  %v1102_v3 = vld [vmem:[%s1643_s9 + $0xa8] sm:$0xf0]  ;;  %v1097_v5 = vor.u32 %v1305_v61, %v1094_v63  ;;  %v1101_v6 = vor.u32 %v1310_v1, %v1100_v0  ;;  %v1060_v7 = vld [vmem:[%s1643_s9 + $0x40] sm:$0xf]  ;;  %v1297_v9 = vld [vmem:[%s1643_s9 + $0x44] sm:$0xf] }
  0x36   : > { %731 = vmatpush.bf16.msra.mxu2 %v1165_v46  ;;  %v1301_v8 = vld [vmem:[%s1643_s9 + $0x5c] sm:$0xf0]  ;;  %v1105_v10 = vor.u32 %v1306_v2, %v1102_v3  ;;  %v1062_v11 = vld [vmem:[%s1643_s9 + $0x60] sm:$0xf0]  ;;  %v1068_v12 = vld [vmem:[%s1643_s9 + $0x48] sm:$0xf] }
  0x37   : > { %745 = vmatpush.bf16.msra.mxu3 %v1169_v50  ;;  %v1302_v13 = vld [vmem:[%s1643_s9 + $0x64] sm:$0xf0]  ;;  %v1298_v14 = vld [vmem:[%s1643_s9 + $0x4c] sm:$0xf]  ;;  %v1061_v16 = vor.u32 %v1301_v8, %v1060_v7  ;;  %v1028_v17 = vld [vmem:[%s1643_s9] sm:$0xf]  ;;  %v1065_v19 = vor.u32 %v1297_v9, %v1062_v11 }
  0x38   : > { %v1070_v15 = vld [vmem:[%s1643_s9 + $0x68] sm:$0xf0]  ;;  %v1293_v18 = vld [vmem:[%s1643_s9 + $0x1c] sm:$0xf0]  ;;  %v1069_v20 = vor.u32 %v1302_v13, %v1068_v12  ;;  %v1289_v21 = vld [vmem:[%s1643_s9 + $0x4] sm:$0xf] }
  0x39   : > { %704 = vmatpush.bf16.msra.mxu0 %v1125_v56  ;;  %718 = vmatpush.bf16.msra.mxu1 %v1129_v57  ;;  %v1030_v22 = vld [vmem:[%s1643_s9 + $0x20] sm:$0xf0]  ;;  %v1036_v23 = vld [vmem:[%s1643_s9 + $0x8] sm:$0xf]  ;;  %v1073_v24 = vor.u32 %v1298_v14, %v1070_v15  ;;  %v1290_v26 = vld [vmem:[%s1643_s9 + $0xc] sm:$0xf]  ;;  %v1029_v31 = vor.u32 %v1293_v18, %v1028_v17 }
  0x3a   : > { %732 = vmatpush.bf16.msra.mxu2 %v1133_v58  ;;  %v1294_v25 = vld [vmem:[%s1643_s9 + $0x24] sm:$0xf0]  ;;  %v1038_v27 = vld [vmem:[%s1643_s9 + $0x28] sm:$0xf0]  ;;  %v1268_v28 = vld [vmem:[%s1643_s9 + $0x1d0] sm:$0xf]  ;;  %v1033_v35 = vor.u32 %v1289_v21, %v1030_v22 }
  0x3b   : > { %746 = vmatpush.bf16.msra.mxu3 %v1137_v62  ;;  %v1351_v29 = vld [vmem:[%s1643_s9 + $0x1ec] sm:$0xf0]  ;;  %v1347_v30 = vld [vmem:[%s1643_s9 + $0x1d4] sm:$0xf]  ;;  %v1276_v33 = vld [vmem:[%s1643_s9 + $0x1d8] sm:$0xf]  ;;  %v1037_v36 = vor.u32 %v1294_v25, %v1036_v23  ;;  %v1041_v39 = vor.u32 %v1290_v26, %v1038_v27 }
  0x3c   : > { %v1270_v32 = vld [vmem:[%s1643_s9 + $0x1f0] sm:$0xf0]  ;;  %v1352_v34 = vld [vmem:[%s1643_s9 + $0x1f4] sm:$0xf0]  ;;  %v1348_v37 = vld [vmem:[%s1643_s9 + $0x1dc] sm:$0xf]  ;;  %v1269_v40 = vor.u32 %v1351_v29, %v1268_v28 }
  0x3d   : > { %705 = vmatpush.bf16.msra.mxu0 %v1093_v4  ;;  %719 = vmatpush.bf16.msra.mxu1 %v1097_v5  ;;  %v1278_v38 = vld [vmem:[%s1643_s9 + $0x1f8] sm:$0xf0]  ;;  %v1236_v41 = vld [vmem:[%s1643_s9 + $0x190] sm:$0xf]  ;;  %v1273_v42 = vor.u32 %v1347_v30, %v1270_v32  ;;  %v1277_v43 = vor.u32 %v1352_v34, %v1276_v33  ;;  %v1339_v45 = vld [vmem:[%s1643_s9 + $0x194] sm:$0xf] }
  0x3e   : > { %733 = vmatpush.bf16.msra.mxu2 %v1101_v6  ;;  %v1343_v44 = vld [vmem:[%s1643_s9 + $0x1ac] sm:$0xf0]  ;;  %v1238_v46 = vld [vmem:[%s1643_s9 + $0x1b0] sm:$0xf0]  ;;  %v1281_v47 = vor.u32 %v1348_v37, %v1278_v38  ;;  %v1244_v48 = vld [vmem:[%s1643_s9 + $0x198] sm:$0xf] }
  0x3f   : > { %747 = vmatpush.bf16.msra.mxu3 %v1105_v10  ;;  %v1344_v49 = vld [vmem:[%s1643_s9 + $0x1b4] sm:$0xf0]  ;;  %v1738_v50 = vld [vmem:[%s1852_s0] sm:$0xff]  ;;  %v1340_v51 = vld [vmem:[%s1643_s9 + $0x19c] sm:$0xf]  ;;  %v1237_v53 = vor.u32 %v1343_v44, %v1236_v41  ;;  %v1241_v54 = vor.u32 %v1339_v45, %v1238_v46  ;;  %s1806_s18 = scalar_lea.vmem [#allocation6], %s1021_s12 }
  0x40   : > { %v1246_v52 = vld [vmem:[%s1643_s9 + $0x1b8] sm:$0xf0]  ;;  %v1245_v55 = vor.u32 %v1344_v49, %v1244_v48  ;;  %v1204_v56 = vld [vmem:[%s1643_s9 + $0x150] sm:$0xf]  ;;  %v1331_v58 = vld [vmem:[%s1643_s9 + $0x154] sm:$0xf] }
  0x41   : > { %706 = vmatpush.bf16.msra.mxu0 %v1061_v16  ;;  %720 = vmatpush.bf16.msra.mxu1 %v1065_v19  ;;  %v1335_v57 = vld [vmem:[%s1643_s9 + $0x16c] sm:$0xf0]  ;;  %v1249_v59 = vor.u32 %v1340_v51, %v1246_v52  ;;  %v1206_v60 = vld [vmem:[%s1643_s9 + $0x170] sm:$0xf0]  ;;  %v1212_v61 = vld [vmem:[%s1643_s9 + $0x158] sm:$0xf] }
  0x42   : > { %734 = vmatpush.bf16.msra.mxu2 %v1069_v20  ;;  %v1336_v62 = vld [vmem:[%s1643_s9 + $0x174] sm:$0xf0]  ;;  %v1332_v63 = vld [vmem:[%s1643_s9 + $0x15c] sm:$0xf]  ;;  %v1205_v1 = vor.u32 %v1335_v57, %v1204_v56  ;;  %v1209_v2 = vor.u32 %v1331_v58, %v1206_v60  ;;  %v1172_v4 = vld [vmem:[%s1643_s9 + $0x110] sm:$0xf] }
  0x43   : > { %748 = vmatpush.bf16.msra.mxu3 %v1073_v24  ;;  %v1214_v0 = vld [vmem:[%s1643_s9 + $0x178] sm:$0xf0]  ;;  %v1213_v3 = vor.u32 %v1336_v62, %v1212_v61  ;;  %v1327_v5 = vld [vmem:[%s1643_s9 + $0x12c] sm:$0xf0]  ;;  %v1323_v6 = vld [vmem:[%s1643_s9 + $0x114] sm:$0xf] }
  0x44   : > { %v1217_v7 = vor.u32 %v1332_v63, %v1214_v0  ;;  %v1174_v8 = vld [vmem:[%s1643_s9 + $0x130] sm:$0xf0]  ;;  %v1180_v9 = vld [vmem:[%s1643_s9 + $0x118] sm:$0xf]  ;;  %v1324_v11 = vld [vmem:[%s1643_s9 + $0x11c] sm:$0xf]  ;;  %v1173_v13 = vor.u32 %v1327_v5, %v1172_v4 }
  0x45   : > { %707 = vmatpush.bf16.msra.mxu0 %v1029_v31  ;;  %721 = vmatpush.bf16.msra.mxu1 %v1033_v35  ;;  %v1328_v10 = vld [vmem:[%s1643_s9 + $0x134] sm:$0xf0]  ;;  %v1182_v12 = vld [vmem:[%s1643_s9 + $0x138] sm:$0xf0]  ;;  %v1177_v14 = vor.u32 %v1323_v6, %v1174_v8  ;;  %v1140_v16 = vld [vmem:[%s1643_s9 + $0xd0] sm:$0xf] }
  0x46   : > { %735 = vmatpush.bf16.msra.mxu2 %v1037_v36  ;;  %v1181_v15 = vor.u32 %v1328_v10, %v1180_v9  ;;  %v1319_v17 = vld [vmem:[%s1643_s9 + $0xec] sm:$0xf0]  ;;  %v1315_v18 = vld [vmem:[%s1643_s9 + $0xd4] sm:$0xf]  ;;  %v1185_v19 = vor.u32 %v1324_v11, %v1182_v12  ;;  %v1148_v21 = vld [vmem:[%s1643_s9 + $0xd8] sm:$0xf] }
  0x47   : > { %749 = vmatpush.bf16.msra.mxu3 %v1041_v39  ;;  %v1142_v20 = vld [vmem:[%s1643_s9 + $0xf0] sm:$0xf0]  ;;  %v1320_v22 = vld [vmem:[%s1643_s9 + $0xf4] sm:$0xf0]  ;;  %v1316_v23 = vld [vmem:[%s1643_s9 + $0xdc] sm:$0xf]  ;;  %v1141_v25 = vor.u32 %v1319_v17, %v1140_v16 }
  0x48   : > { %708 = vmatmul.bf16.vlgmr.msra.gmra.mxu0 %v1738_v50  ;;  %722 = vmatmul.bf16.vlgmr.msra.gmra.mxu1 %v1738_v50  ;;  %v1150_v24 = vld [vmem:[%s1643_s9 + $0xf8] sm:$0xf0]  ;;  %v1145_v26 = vor.u32 %v1315_v18, %v1142_v20  ;;  %v1149_v27 = vor.u32 %v1320_v22, %v1148_v21  ;;  %v1108_v28 = vld [vmem:[%s1643_s9 + $0x90] sm:$0xf]  ;;  %v1307_v30 = vld [vmem:[%s1643_s9 + $0x94] sm:$0xf] }
  0x49   : > { %756 = vmatpush.bf16.msrb.mxu0 %v1269_v40  ;;  %770 = vmatpush.bf16.msrb.mxu1 %v1273_v42  ;;  %v1311_v29 = vld [vmem:[%s1643_s9 + $0xac] sm:$0xf0]  ;;  %v1153_v31 = vor.u32 %v1316_v23, %v1150_v24  ;;  %v1110_v32 = vld [vmem:[%s1643_s9 + $0xb0] sm:$0xf0]  ;;  %v1116_v33 = vld [vmem:[%s1643_s9 + $0x98] sm:$0xf] }
  0x4a   : > { %784 = vmatpush.bf16.msrb.mxu2 %v1277_v43  ;;  %750 = vmatmul.bf16.vlgmr.msra.gmra.mxu3 %v1738_v50  ;;  %v1312_v34 = vld [vmem:[%s1643_s9 + $0xb4] sm:$0xf0]  ;;  %v1308_v35 = vld [vmem:[%s1643_s9 + $0x9c] sm:$0xf]  ;;  %v1109_v37 = vor.u32 %v1311_v29, %v1108_v28  ;;  %v1113_v38 = vor.u32 %v1307_v30, %v1110_v32  ;;  %v1076_v40 = vld [vmem:[%s1643_s9 + $0x50] sm:$0xf] }
  0x4b   : > { %798 = vmatpush.bf16.msrb.mxu3 %v1281_v47  ;;  %736 = vmatmul.bf16.vlgmr.msra.gmra.mxu2 %v1738_v50  ;;  %v1118_v36 = vld [vmem:[%s1643_s9 + $0xb8] sm:$0xf0]  ;;  %v1117_v39 = vor.u32 %v1312_v34, %v1116_v33  ;;  %v1303_v41 = vld [vmem:[%s1643_s9 + $0x6c] sm:$0xf0]  ;;  %v1299_v42 = vld [vmem:[%s1643_s9 + $0x54] sm:$0xf] }
  0x4c   : > { %v1121_v43 = vor.u32 %v1308_v35, %v1118_v36  ;;  %v1078_v44 = vld [vmem:[%s1643_s9 + $0x70] sm:$0xf0]  ;;  %v1084_v45 = vld [vmem:[%s1643_s9 + $0x58] sm:$0xf]  ;;  %v1300_v47 = vld [vmem:[%s1643_s9 + $0x5c] sm:$0xf]  ;;  %v1077_v49 = vor.u32 %v1303_v41, %v1076_v40 }
  0x4d   : > { %757 = vmatpush.bf16.msrb.mxu0 %v1237_v53  ;;  %771 = vmatpush.bf16.msrb.mxu1 %v1241_v54  ;;  %v1304_v46 = vld [vmem:[%s1643_s9 + $0x74] sm:$0xf0]  ;;  %v1086_v48 = vld [vmem:[%s1643_s9 + $0x78] sm:$0xf0]  ;;  %v1081_v51 = vor.u32 %v1299_v42, %v1078_v44  ;;  %v1044_v53 = vld [vmem:[%s1643_s9 + $0x10] sm:$0xf] }
  0x4e   : > { %785 = vmatpush.bf16.msrb.mxu2 %v1245_v55  ;;  %v1085_v52 = vor.u32 %v1304_v46, %v1084_v45  ;;  %v1295_v54 = vld [vmem:[%s1643_s9 + $0x2c] sm:$0xf0]  ;;  %v1291_v55 = vld [vmem:[%s1643_s9 + $0x14] sm:$0xf]  ;;  %v1089_v56 = vor.u32 %v1300_v47, %v1086_v48  ;;  %v1052_v58 = vld [vmem:[%s1643_s9 + $0x18] sm:$0xf] }
  0x4f   : > { %799 = vmatpush.bf16.msrb.mxu3 %v1249_v59  ;;  %v1046_v57 = vld [vmem:[%s1643_s9 + $0x30] sm:$0xf0]  ;;  %v1296_v59 = vld [vmem:[%s1643_s9 + $0x34] sm:$0xf0]  ;;  %v1292_v60 = vld [vmem:[%s1643_s9 + $0x1c] sm:$0xf]  ;;  %v1045_v62 = vor.u32 %v1295_v54, %v1044_v53 }
  0x50   : > { %v1054_v61 = vld [vmem:[%s1643_s9 + $0x38] sm:$0xf0]  ;;  %v1049_v63 = vor.u32 %v1291_v55, %v1046_v57  ;;  %v1053_v0 = vor.u32 %v1296_v59, %v1052_v58  ;;  %s1353_s20 = sshll.u32 (%p1606_p9), %s1523_s15, 5 }
  0x51   : > { %758 = vmatpush.bf16.msrb.mxu0 %v1205_v1  ;;  %772 = vmatpush.bf16.msrb.mxu1 %v1209_v2  ;;  %v1057_v1 = vor.u32 %v1292_v60, %v1054_v61  ;;  %v1799_v2 = vld [vmem:[%s1651_s10] sm:$0xff]  ;;  %s856_s27 = scalar_lea.vmem (%p1606_p9), %s1855_s3, %s1353_s20 }
  0x52   : > { %786 = vmatpush.bf16.msrb.mxu2 %v1213_v3  ;;  %v358_v3 = vperm.slane %v1799_v2, 0  ;;  %v359_v4 = vperm.slane %v1799_v2, 1  ;;  %v360_v9 = vperm.slane %v1799_v2, 2  ;;  %v361_v11 = vperm.slane %v1799_v2, 3 }
  0x53   : > { %800 = vmatpush.bf16.msrb.mxu3 %v1217_v7  ;;  %v362_v34 = vperm.slane %v1799_v2, 4  ;;  %v363_v35 = vperm.slane %v1799_v2, 5  ;;  %v364_v42 = vperm.slane %v1799_v2, 6 }
  0x55   : > { %759 = vmatpush.bf16.msrb.mxu0 %v1173_v13  ;;  %773 = vmatpush.bf16.msrb.mxu1 %v1177_v14 }
  0x56   : > { %787 = vmatpush.bf16.msrb.mxu2 %v1181_v15 }
  0x57   : > { %801 = vmatpush.bf16.msrb.mxu3 %v1185_v19 }
  0x59   : > { %760 = vmatpush.bf16.msrb.mxu0 %v1141_v25  ;;  %774 = vmatpush.bf16.msrb.mxu1 %v1145_v26 }
  0x5a   : > { %788 = vmatpush.bf16.msrb.mxu2 %v1149_v27 }
  0x5b   : > { %802 = vmatpush.bf16.msrb.mxu3 %v1153_v31 }
  0x5d   : > { %761 = vmatpush.bf16.msrb.mxu0 %v1109_v37  ;;  %775 = vmatpush.bf16.msrb.mxu1 %v1113_v38 }
  0x5e   : > { %789 = vmatpush.bf16.msrb.mxu2 %v1117_v39 }
  0x5f   : > { %803 = vmatpush.bf16.msrb.mxu3 %v1121_v43  ;;  %v365_v43 = vperm.slane %v1799_v2, 7 }
  0x61   : > { %762 = vmatpush.bf16.msrb.mxu0 %v1077_v49  ;;  %776 = vmatpush.bf16.msrb.mxu1 %v1081_v51 }
  0x62   : > { %790 = vmatpush.bf16.msrb.mxu2 %v1085_v52 }
  0x63   : > { %804 = vmatpush.bf16.msrb.mxu3 %v1089_v56 }
  0x65   : > { %763 = vmatpush.bf16.msrb.mxu0 %v1045_v62  ;;  %777 = vmatpush.bf16.msrb.mxu1 %v1049_v63 }
  0x66   : > { %791 = vmatpush.bf16.msrb.mxu2 %v1053_v0 }
  0x67   : > { %805 = vmatpush.bf16.msrb.mxu3 %v1057_v1 }
  0x68   : > { %764 = vmatmul.bf16.vlgmr.msrb.gmra.mxu0 %v1738_v50  ;;  %778 = vmatmul.bf16.vlgmr.msrb.gmra.mxu1 %v1738_v50 }
  0x69   : > { %792 = vmatmul.bf16.vlgmr.msrb.gmra.mxu2 %v1738_v50 }
  0x6a   : > { %806 = vmatmul.bf16.vlgmr.msrb.gmra.mxu3 %v1738_v50 }
  0xc5   : > { %v709_v5 = vpop.f32.mrf.mxu0  ;;  %v723_v7 = vpop.f32.mrf.mxu1 }
  0xc6   : > { %v710_v6 = vadd.f32 %v709_v5, %v358_v3  ;;  %v724_v8 = vadd.f32 %v723_v7, %v359_v4 }
  0xc8   : > { %v812_v10 = vmax.f32 %v710_v6, 0.0  ;;  %v813_v12 = vmax.f32 %v724_v8, 0.0 }
  0xca   : > { %v828_v14 = vpack.c.bf16 %v813_v12, %v812_v10 }
  0xcc   : > { %836 = vst [vmem:[%s1806_s18] sm:$0xff] %v828_v14 }
  0xcd   : > { %v751_v15 = vpop.f32.mrf.mxu3  ;;  %v711_v18 = vpop.f32.mrf.mxu0 }
  0xce   : > { %v737_v13 = vpop.f32.mrf.mxu2  ;;  %v752_v16 = vadd.f32 %v751_v15, %v361_v11  ;;  %v712_v20 = vadd.f32 %v711_v18, %v358_v3  ;;  %v725_v21 = vpop.f32.mrf.mxu1 }
  0xcf   : > { %v738_v50 = vadd.f32 %v737_v13, %v360_v9  ;;  %v726_v22 = vadd.f32 %v725_v21, %v359_v4 }
  0xd0   : > { %v815_v19 = vmax.f32 %v752_v16, 0.0  ;;  %v820_v24 = vmax.f32 %v712_v20, 0.0 }
  0xd1   : > { %v814_v17 = vmax.f32 %v738_v50, 0.0  ;;  %v821_v25 = vmax.f32 %v726_v22, 0.0 }
  0xd3   : > { %v829_v23 = vpack.c.bf16 %v815_v19, %v814_v17  ;;  %v832_v27 = vpack.c.bf16 %v821_v25, %v820_v24  ;;  %v869_v3 = vld [vmem:[%s1806_s18] sm:$0xff] (%p1606_p9) }
  0xd4   : > { %870 = vst [vmem:[%s856_s27] sm:$0xff] (%p1606_p9), %v869_v3 }
  0xd5   : > { %837 = vst [vmem:[%s1806_s18 + $0x8] sm:$0xff] %v829_v23  ;;  %v753_v29 = vpop.f32.mrf.mxu3 }
  0xd6   : > { %v739_v26 = vpop.f32.mrf.mxu2  ;;  %v754_v30 = vadd.f32 %v753_v29, %v361_v11  ;;  %840 = vst [vmem:[%s1806_s18 + $0x20] sm:$0xff] %v832_v27 }
  0xd7   : > { %v740_v28 = vadd.f32 %v739_v26, %v360_v9 }
  0xd8   : > { %v823_v32 = vmax.f32 %v754_v30, 0.0 }
  0xd9   : > { %v822_v31 = vmax.f32 %v740_v28, 0.0 }
  0xdb   : > { %v833_v33 = vpack.c.bf16 %v823_v32, %v822_v31 }
  0xdc   : > { %v871_v4 = vld [vmem:[%s1806_s18 + $0x8] sm:$0xff] (%p1606_p9) }
  0xdd   : > { %841 = vst [vmem:[%s1806_s18 + $0x28] sm:$0xff] %v833_v33  ;;  %v877_v7 = vld [vmem:[%s1806_s18 + $0x20] sm:$0xff] (%p1606_p9) }
  0xde   : > { %872 = vst [vmem:[%s856_s27 + $0x8] sm:$0xff] (%p1606_p9), %v871_v4 }
  0xdf   : > { %878 = vst [vmem:[%s856_s27 + $0x80] sm:$0xff] (%p1606_p9), %v877_v7 }
  0xe4   : > { %v879_v8 = vld [vmem:[%s1806_s18 + $0x28] sm:$0xff] (%p1606_p9) }
  0xe5   : > { %v765_v36 = vpop.f32.mrf.mxu0  ;;  %v779_v38 = vpop.f32.mrf.mxu1  ;;  %880 = vst [vmem:[%s856_s27 + $0x88] sm:$0xff] (%p1606_p9), %v879_v8 }
  0xe6   : > { %v766_v37 = vadd.f32 %v765_v36, %v362_v34  ;;  %v780_v39 = vadd.f32 %v779_v38, %v363_v35 }
  0xe8   : > { %v816_v40 = vmax.f32 %v766_v37, 0.0  ;;  %v817_v41 = vmax.f32 %v780_v39, 0.0 }
  0xea   : > { %v830_v44 = vpack.c.bf16 %v817_v41, %v816_v40 }
  0xec   : > { %v793_v45 = vpop.f32.mrf.mxu2  ;;  %838 = vst [vmem:[%s1806_s18 + $0x10] sm:$0xff] %v830_v44 }
  0xed   : > { %v794_v46 = vadd.f32 %v793_v45, %v364_v42  ;;  %v807_v47 = vpop.f32.mrf.mxu3  ;;  %v767_v48 = vpop.f32.mrf.mxu0 }
  0xee   : > { %v808_v49 = vadd.f32 %v807_v47, %v365_v43  ;;  %v768_v51 = vadd.f32 %v767_v48, %v362_v34  ;;  %v781_v52 = vpop.f32.mrf.mxu1 }
  0xef   : > { %v818_v53 = vmax.f32 %v794_v46, 0.0  ;;  %v782_v54 = vadd.f32 %v781_v52, %v363_v35 }
  0xf0   : > { %v819_v55 = vmax.f32 %v808_v49, 0.0  ;;  %v824_v56 = vmax.f32 %v768_v51, 0.0 }
  0xf1   : > { %v825_v57 = vmax.f32 %v782_v54, 0.0 }
  0xf2   : > { %v831_v58 = vpack.c.bf16 %v819_v55, %v818_v53 }
  0xf3   : > { %v834_v59 = vpack.c.bf16 %v825_v57, %v824_v56  ;;  %v873_v5 = vld [vmem:[%s1806_s18 + $0x10] sm:$0xff] (%p1606_p9) }
  0xf4   : > { %839 = vst [vmem:[%s1806_s18 + $0x18] sm:$0xff] %v831_v58  ;;  %v795_v60 = vpop.f32.mrf.mxu2 }
  0xf5   : > { %842 = vst [vmem:[%s1806_s18 + $0x30] sm:$0xff] %v834_v59  ;;  %v796_v61 = vadd.f32 %v795_v60, %v364_v42  ;;  %v809_v62 = vpop.f32.mrf.mxu3 }
  0xf6   : > { %v810_v63 = vadd.f32 %v809_v62, %v365_v43  ;;  %874 = vst [vmem:[%s856_s27 + $0x10] sm:$0xff] (%p1606_p9), %v873_v5 }
  0xf7   : > { %v826_v0 = vmax.f32 %v796_v61, 0.0 }
  0xf8   : > { %v827_v1 = vmax.f32 %v810_v63, 0.0  ;;  %850 = sbr.rel (!%p1606_p9) target bundleno = 261 (0x105), region = 44 }
  0xfa   : > { %v835_v2 = vpack.c.bf16 %v827_v1, %v826_v0 }
  0xfb   : > { %v875_v6 = vld [vmem:[%s1806_s18 + $0x18] sm:$0xff] (%p1606_p9) }
  0xfc   : > { %843 = vst [vmem:[%s1806_s18 + $0x38] sm:$0xff] %v835_v2  ;;  %v881_v9 = vld [vmem:[%s1806_s18 + $0x30] sm:$0xff] (%p1606_p9) }
  0xfd   : > { %876 = vst [vmem:[%s856_s27 + $0x18] sm:$0xff] %v875_v6 }
  0xfe   : > { %882 = vst [vmem:[%s856_s27 + $0x90] sm:$0xff] %v881_v9 }
 0x103   : > { %v883_v10 = vld [vmem:[%s1806_s18 + $0x38] sm:$0xff] }
 0x104   : > { %884 = vst [vmem:[%s856_s27 + $0x98] sm:$0xff] %v883_v10 }
 0x105 PF: > { %s19_s17 = sadd.s32 1, %s1531_s17   ;;  %s1860_s12 = smov %s1515_s13 }
 0x106   : > { %p16_p1 = scmp.ge.s32.totalorder %s19_s17, 6   ;;  %s1861_s13 = smov %s1519_s14 }
 0x107   : > { %s1862_s14 = smov %s1604_s24  ;;  %s1863_s15 = smov %s1527_s16 }
 0x108   : > { %s1864_s16 = smov %s1866_s19  ;;  %18 = sbr.rel (!%p16_p1) target bundleno = 6 (0x6), region = 111 }
 0x10d   :  { %900 = vsyncpa [#allocation3], 1 }
 0x10e   :  { %902 = vsyncpa [#allocation3 + $0x1], 1 }
 0x10f   :  { %903 = vsyncpa [#allocation5], 1 }
 0x110   :  { %905 = vsyncpa [#allocation5 + $0x1], 1 }

</bundles_post_ra>
